<compile_context>
chip_gen: v7x
topology: tpu7x:2x2x1
jax: 0.10.0
libtpu: 0.0.40
codegen_flags: <defaults>
</compile_context>

<pallas_src>
import functools

import jax
import jax.numpy as jnp
from jax.experimental import pallas as pl
from jax.experimental.pallas import tpu as pltpu


def _round_up(x, n):
    return ((x + n - 1) // n) * n


def _bias_layout(widths):
    """128-lane-aligned slots for the packed bias buffer -> (offsets, total)."""
    offsets, cur = [], 0
    for w in widths:
        offsets.append(cur)
        cur += _round_up(w, 128)
    return tuple(offsets), cur


# ----------------------------- Pallas kernel --------------------------------

def _pvae_kernel(act_ref, w128_ref, w64_ref, wz_ref, wd3_ref, b_ref, out_ref,
                 *, F, H, L, E1, E2, D1, D2, boff):
    f32 = jnp.float32
    cdt = w128_ref.dtype  # matmul-input dtype (f32 or bf16); accumulation is f32

    act = act_ref[...]                                   # (TB, 2F+H+L) = [x|m|h|eps]
    x = act[:, 0:F]
    m = act[:, F:2 * F]
    mh = act[:, F:2 * F + H]                             # fused [m | h] operand
    h = act[:, 2 * F:2 * F + H]
    eps = act[:, 2 * F + H:2 * F + H + L].astype(f32)

    masked_x = x * m

    # Packed weights (static slices at 8-aligned row offsets).
    w1x = w128_ref[0:F, :]                               # (F,   E1)
    w1mh = w128_ref[F:2 * F + H, :]                      # (F+H, E1)
    wd2 = w128_ref[2 * F + H:2 * F + H + D1, :]          # (D1,  D2 == E1)
    w2 = w64_ref[0:E1, :]                                # (E1,  E2)
    wd1z = w64_ref[E1:E1 + L, :]                         # (L,   D1 == E2)
    wd1h = w64_ref[E1 + L:E1 + L + H, :]                 # (H,   D1 == E2)

    # Packed biases (f32, 128-lane-aligned slots).
    b1 = b_ref[:, boff[0]:boff[0] + E1]
    b2 = b_ref[:, boff[1]:boff[1] + E2]
    bz = b_ref[:, boff[2]:boff[2] + 2 * L]
    bd1 = b_ref[:, boff[3]:boff[3] + D1]
    bd2 = b_ref[:, boff[4]:boff[4] + D2]
    bd3 = b_ref[:, boff[5]:boff[5] + F]

    # ---- encoder MLP (layer 1: two matmuls = masked_x segment + [m|h] segment) ----
    h1 = (jnp.dot(masked_x, w1x, preferred_element_type=f32)
          + jnp.dot(mh, w1mh, preferred_element_type=f32)
          + b1)
    h1 = jnp.maximum(h1, 0.0)
    h2 = jnp.maximum(
        jnp.dot(h1.astype(cdt), w2, preferred_element_type=f32) + b2, 0.0)

    # ---- fused latent heads: one matmul -> [z_mean | z_logvar] ----
    zml = jnp.dot(h2.astype(cdt), wz_ref[...], preferred_element_type=f32) + bz
    z_mean = zml[:, 0:L]
    z_logvar = zml[:, L:2 * L]

    # ---- reparameterize (exp on EUP, free under MXU/DMA slack) ----
    z = z_mean + eps * jnp.exp(0.5 * z_logvar)

    # ---- decoder MLP (layer 1: z segment + h segment of the concat weight) ----
    d1 = (jnp.dot(z.astype(cdt), wd1z, preferred_element_type=f32)
          + jnp.dot(h, wd1h, preferred_element_type=f32)
          + bd1)
    d1 = jnp.maximum(d1, 0.0)
    d2 = jnp.maximum(
        jnp.dot(d1.astype(cdt), wd2, preferred_element_type=f32) + bd2, 0.0)
    x_prime_mu = jnp.dot(d2.astype(cdt), wd3_ref[...],
                         preferred_element_type=f32) + bd3

    # Single lane-packed store: [x_prime_mu | z_mean | z_logvar].
    out_ref[...] = jnp.concatenate([x_prime_mu, zml], axis=1).astype(out_ref.dtype)


# ----------------------------- parameter handling ---------------------------

def init_partial_vae_params(key, feature_dim, hidden_dim_grud, latent_dim,
                            encoder_hidden_dims=(128, 64),
                            decoder_hidden_dims=(64, 128)):
    """PyTorch-like Kaiming-uniform init; weights stored [in, out]."""
    def linear(key, fan_in, fan_out):
        kw, kb = jax.random.split(key)
        bound = 1.0 / jnp.sqrt(jnp.asarray(fan_in, jnp.float32))
        w = jax.random.uniform(kw, (fan_in, fan_out), jnp.float32, -bound, bound)
        b = jax.random.uniform(kb, (1, fan_out), jnp.float32, -bound, bound)
        return w, b

    keys = jax.random.split(key, 7)
    enc_in = feature_dim * 2 + hidden_dim_grud
    E1, E2 = encoder_hidden_dims
    D1, D2 = decoder_hidden_dims

    w1, b1 = linear(keys[0], enc_in, E1)
    w2, b2 = linear(keys[1], E1, E2)
    wzm, bzm = linear(keys[2], E2, latent_dim)
    wzl, bzl = linear(keys[3], E2, latent_dim)
    wd1, bd1 = linear(keys[4], latent_dim + hidden_dim_grud, D1)
    wd2, bd2 = linear(keys[5], D1, D2)
    wd3, bd3 = linear(keys[6], D2, feature_dim)

    return dict(w1=w1, b1=b1, w2=w2, b2=b2, wzm=wzm, bzm=bzm, wzl=wzl, bzl=bzl,
                wd1=wd1, bd1=bd1, wd2=wd2, bd2=bd2, wd3=wd3, bd3=bd3)


def pack_partial_vae_params(raw, feature_dim, hidden_dim_grud, latent_dim,
                            weights_dtype=jnp.float32):
    """Pack the 14 per-layer tensors into 5 kernel buffers (done once)."""
    F, H, L = feature_dim, hidden_dim_grud, latent_dim
    E1, E2 = raw["w1"].shape[1], raw["w2"].shape[1]
    D1, D2 = raw["wd1"].shape[1], raw["wd2"].shape[1]
    assert E1 == D2 and E2 == D1, (
        "weight packing assumes encoder_hidden_dims == reversed(decoder_hidden_dims)")

    # rows: [W1(x seg); W1(m|h seg); Wd2]  -- all with output width E1
    w_n128 = jnp.concatenate([raw["w1"], raw["wd2"]], axis=0).astype(weights_dtype)
    # rows: [W2; Wd1(z seg); Wd1(h seg)]   -- all with output width E2
    w_n64 = jnp.concatenate([raw["w2"], raw["wd1"]], axis=0).astype(weights_dtype)
    # fused latent heads: [W_zmean | W_zlogvar]
    wz = jnp.concatenate([raw["wzm"], raw["wzl"]], axis=1).astype(weights_dtype)
    wd3 = raw["wd3"].astype(weights_dtype)

    widths = (E1, E2, 2 * L, D1, D2, F)
    boff, total = _bias_layout(widths)
    segments = (raw["b1"], raw["b2"],
                jnp.concatenate([raw["bzm"], raw["bzl"]], axis=1),
                raw["bd1"], raw["bd2"], raw["bd3"])
    b_pack = jnp.zeros((1, total), jnp.float32)
    for off, seg in zip(boff, segments):
        b_pack = b_pack.at[:, off:off + seg.shape[1]].set(seg.astype(jnp.float32))

    return dict(w_n128=w_n128, w_n64=w_n64, wz=wz, wd3=wd3, b_pack=b_pack)


# ----------------------------- JAX wrapper -----------------------------------

@jax.jit
def partial_vae_forward(packed, x_t, m_t, h_grud_t, eps):
    """Pallas-backed forward: returns (x_prime_mu, z_mean, z_logvar)."""
    B, F = x_t.shape
    if h_grud_t.ndim == 1:
        h_grud_t = h_grud_t[None, :]
    if h_grud_t.shape[0] != B:
        h_grud_t = jnp.broadcast_to(h_grud_t, (B, h_grud_t.shape[1]))
    H = h_grud_t.shape[1]
    L = eps.shape[1]

    E1 = packed["w_n128"].shape[1]
    E2 = packed["w_n64"].shape[1]
    D1 = packed["w_n128"].shape[0] - (2 * F + H)
    D2 = packed["wd3"].shape[0]
    boff, _ = _bias_layout((E1, E2, 2 * L, D1, D2, F))

    cdt = packed["w_n128"].dtype
    # Single activation slab [x | m | h | eps]; masking (x*m) stays in-kernel.
    act = jnp.concatenate([x_t, m_t, h_grud_t, eps], axis=1).astype(cdt)

    TB = 256 if B >= 256 else 128          # MXU-friendly batch tile (>=128 rows)
    B_pad = _round_up(B, TB)
    if B_pad != B:
        act = jnp.pad(act, ((0, B_pad - B), (0, 0)))

    A = 2 * F + H + L
    OW = F + 2 * L
    grid = (B_pad // TB,)

    kernel = functools.partial(
        _pvae_kernel, F=F, H=H, L=L, E1=E1, E2=E2, D1=D1, D2=D2, boff=boff)

    def resident(shape):                    # weights: same block every grid step
        return pl.BlockSpec(shape, lambda i: (0, 0))

    out = pl.pallas_call(
        kernel,
        out_shape=jax.ShapeDtypeStruct((B_pad, OW), jnp.float32),
        grid=grid,
        in_specs=[
            pl.BlockSpec((TB, A), lambda i: (i, 0)),     # activations (tiled batch)
            resident(packed["w_n128"].shape),
            resident(packed["w_n64"].shape),
            resident(packed["wz"].shape),
            resident(packed["wd3"].shape),
            resident(packed["b_pack"].shape),
        ],
        out_specs=pl.BlockSpec((TB, OW), lambda i: (i, 0)),
        compiler_params=pltpu.CompilerParams(
            dimension_semantics=("parallel",)),          # 2 TCs on v7x split tiles
    )(act, packed["w_n128"], packed["w_n64"], packed["wz"],
      packed["wd3"], packed["b_pack"])

    x_prime_mu = out[:B, 0:F]
    z_mean = out[:B, F:F + L]
    z_logvar = out[:B, F + L:F + 2 * L]
    return x_prime_mu, z_mean, z_logvar


# Pure-JAX reference (torch-style concatenated inputs, full weights).
def _reference_forward(raw, x_t, m_t, h_grud_t, eps):
    enc_in = jnp.concatenate([x_t * m_t, m_t, h_grud_t], axis=1)
    h1 = jnp.maximum(enc_in @ raw["w1"] + raw["b1"], 0.0)
    h2 = jnp.maximum(h1 @ raw["w2"] + raw["b2"], 0.0)
    z_mean = h2 @ raw["wzm"] + raw["bzm"]
    z_logvar = h2 @ raw["wzl"] + raw["bzl"]
    z = z_mean + eps * jnp.exp(0.5 * z_logvar)
    dec_in = jnp.concatenate([z, h_grud_t], axis=1)
    d1 = jnp.maximum(dec_in @ raw["wd1"] + raw["bd1"], 0.0)
    d2 = jnp.maximum(d1 @ raw["wd2"] + raw["bd2"], 0.0)
    x_prime_mu = d2 @ raw["wd3"] + raw["bd3"]
    return x_prime_mu, z_mean, z_logvar


if __name__ == "__main__":
    feature_dim = 16
    hidden_dim_grud = 32
    latent_dim = 8
    batch = 4

    key = jax.random.PRNGKey(0)
    k_params, k_x, k_m, k_h, k_eps = jax.random.split(key, 5)

    raw = init_partial_vae_params(k_params, feature_dim, hidden_dim_grud, latent_dim)
    packed = pack_partial_vae_params(raw, feature_dim, hidden_dim_grud, latent_dim)

    x_t = jax.random.normal(k_x, (batch, feature_dim), jnp.float32)
    m_t = (jax.random.uniform(k_m, (batch, feature_dim)) > 0.3).astype(jnp.float32)
    h_grud_t = jax.random.normal(k_h, (batch, hidden_dim_grud), jnp.float32)
    # eps ~ N(0,1), same role as torch.randn_like in reparameterize()
    eps = jax.random.normal(k_eps, (batch, latent_dim), jnp.float32)

    got = partial_vae_forward(packed, x_t, m_t, h_grud_t, eps)
    jax.block_until_ready(got)

    want = _reference_forward(raw, x_t, m_t, h_grud_t, eps)
    for g, w in zip(got, want):
        assert g.shape == w.shape, (g.shape, w.shape)
        assert jnp.allclose(g, w, atol=1e-4, rtol=1e-4), "mismatch vs reference"

    # bf16-weight path (recommended on v6e/v7x): verify it compiles/runs & is finite.
    packed_bf16 = pack_partial_vae_params(
        raw, feature_dim, hidden_dim_grud, latent_dim, weights_dtype=jnp.bfloat16)
    got_bf16 = partial_vae_forward(packed_bf16, x_t, m_t, h_grud_t, eps)
    jax.block_until_ready(got_bf16)
    assert all(bool(jnp.all(jnp.isfinite(o))) for o in got_bf16)

    # TODO(synk): loss_function / sample_conditional are host-side compositions of
    # this forward (reductions + reshape) and are not fused into the kernel.
    print("KERNEL_OK")
</pallas_src>

<mosaic_0001>
module attributes {stable_mosaic.version = 11 : i64} {
  func.func @_pvae_kernel(%arg0: i32, %arg1: memref<128x72xf32, #tpu.memory_space<vmem>>, %arg2: memref<128x128xf32, #tpu.memory_space<vmem>>, %arg3: memref<168x64xf32, #tpu.memory_space<vmem>>, %arg4: memref<64x16xf32, #tpu.memory_space<vmem>>, %arg5: memref<128x16xf32, #tpu.memory_space<vmem>>, %arg6: memref<1x768xf32, #tpu.memory_space<vmem>>, %arg7: memref<128x32xf32, #tpu.memory_space<vmem>>) attributes {dimension_semantics = [#tpu.dimension_semantics<parallel>], iteration_bounds = array<i64: 1>, scalar_prefetch = 0 : i64, scratch_operands = 0 : i64, tpu.core_type = #tpu.core_type<tc>, window_params = [{transform_indices = @transform_0, window_bounds = array<i64: 128, 72>}, {pipeline_mode = #tpu.pipeline_mode<synchronous>, transform_indices = @transform_1, window_bounds = array<i64: 128, 128>}, {pipeline_mode = #tpu.pipeline_mode<synchronous>, transform_indices = @transform_2, window_bounds = array<i64: 168, 64>}, {pipeline_mode = #tpu.pipeline_mode<synchronous>, transform_indices = @transform_3, window_bounds = array<i64: 64, 16>}, {pipeline_mode = #tpu.pipeline_mode<synchronous>, transform_indices = @transform_4, window_bounds = array<i64: 128, 16>}, {pipeline_mode = #tpu.pipeline_mode<synchronous>, transform_indices = @transform_5, window_bounds = array<i64: 1, 768>}, {transform_indices = @transform_6, window_bounds = array<i64: 128, 32>}]} {
    %c0 = arith.constant 0 : index
    %c0_0 = arith.constant 0 : index
    %0 = vector.load %arg1[%c0, %c0_0] : memref<128x72xf32, #tpu.memory_space<vmem>>, vector<128x72xf32>
    %1 = vector.extract_strided_slice %0 {offsets = [0, 0], sizes = [128, 16], strides = [1, 1]} : vector<128x72xf32> to vector<128x16xf32>
    %2 = vector.extract_strided_slice %0 {offsets = [0, 16], sizes = [128, 16], strides = [1, 1]} : vector<128x72xf32> to vector<128x16xf32>
    %3 = vector.extract_strided_slice %0 {offsets = [0, 16], sizes = [128, 48], strides = [1, 1]} : vector<128x72xf32> to vector<128x48xf32>
    %4 = vector.extract_strided_slice %0 {offsets = [0, 32], sizes = [128, 32], strides = [1, 1]} : vector<128x72xf32> to vector<128x32xf32>
    %5 = vector.extract_strided_slice %0 {offsets = [0, 64], sizes = [128, 8], strides = [1, 1]} : vector<128x72xf32> to vector<128x8xf32>
    %6 = arith.mulf %1, %2 : vector<128x16xf32>
    %c0_1 = arith.constant 0 : index
    %c0_2 = arith.constant 0 : index
    %7 = vector.load %arg2[%c0_1, %c0_2] : memref<128x128xf32, #tpu.memory_space<vmem>>, vector<16x128xf32>
    %c16 = arith.constant 16 : index
    %c0_3 = arith.constant 0 : index
    %8 = vector.load %arg2[%c16, %c0_3] : memref<128x128xf32, #tpu.memory_space<vmem>>, vector<48x128xf32>
    %c64 = arith.constant 64 : index
    %c0_4 = arith.constant 0 : index
    %9 = vector.load %arg2[%c64, %c0_4] : memref<128x128xf32, #tpu.memory_space<vmem>>, vector<64x128xf32>
    %c0_5 = arith.constant 0 : index
    %c0_6 = arith.constant 0 : index
    %10 = vector.load %arg3[%c0_5, %c0_6] : memref<168x64xf32, #tpu.memory_space<vmem>>, vector<128x64xf32>
    %c128 = arith.constant 128 : index
    %c0_7 = arith.constant 0 : index
    %11 = vector.load %arg3[%c128, %c0_7] : memref<168x64xf32, #tpu.memory_space<vmem>>, vector<8x64xf32>
    %c136 = arith.constant 136 : index
    %c0_8 = arith.constant 0 : index
    %12 = vector.load %arg3[%c136, %c0_8] : memref<168x64xf32, #tpu.memory_space<vmem>>, vector<32x64xf32>
    %c0_9 = arith.constant 0 : index
    %c0_10 = arith.constant 0 : index
    %13 = vector.load %arg6[%c0_9, %c0_10] : memref<1x768xf32, #tpu.memory_space<vmem>>, vector<1x128xf32>
    %c0_11 = arith.constant 0 : index
    %c128_12 = arith.constant 128 : index
    %14 = vector.load %arg6[%c0_11, %c128_12] : memref<1x768xf32, #tpu.memory_space<vmem>>, vector<1x64xf32>
    %c0_13 = arith.constant 0 : index
    %c256 = arith.constant 256 : index
    %15 = vector.load %arg6[%c0_13, %c256] : memref<1x768xf32, #tpu.memory_space<vmem>>, vector<1x16xf32>
    %c0_14 = arith.constant 0 : index
    %c384 = arith.constant 384 : index
    %16 = vector.load %arg6[%c0_14, %c384] : memref<1x768xf32, #tpu.memory_space<vmem>>, vector<1x64xf32>
    %c0_15 = arith.constant 0 : index
    %c512 = arith.constant 512 : index
    %17 = vector.load %arg6[%c0_15, %c512] : memref<1x768xf32, #tpu.memory_space<vmem>>, vector<1x128xf32>
    %c0_16 = arith.constant 0 : index
    %c640 = arith.constant 640 : index
    %18 = vector.load %arg6[%c0_16, %c640] : memref<1x768xf32, #tpu.memory_space<vmem>>, vector<1x16xf32>
    %cst = arith.constant dense<0.000000e+00> : vector<128x128xf32>
    %19 = tpu.matmul %6, %7, %cst {dimension_numbers = #tpu.dot_dimension_numbers<[1], [0], [0], [1], [0, 0, 1, 1], [], []>} : vector<128x16xf32>, vector<16x128xf32>, vector<128x128xf32> -> vector<128x128xf32>
    %cst_17 = arith.constant dense<0.000000e+00> : vector<128x128xf32>
    %20 = tpu.matmul %3, %8, %cst_17 {dimension_numbers = #tpu.dot_dimension_numbers<[1], [0], [0], [1], [0, 0, 1, 1], [], []>} : vector<128x48xf32>, vector<48x128xf32>, vector<128x128xf32> -> vector<128x128xf32>
    %21 = arith.addf %19, %20 : vector<128x128xf32>
    %22 = vector.broadcast %13 : vector<1x128xf32> to vector<128x128xf32>
    %23 = arith.addf %21, %22 : vector<128x128xf32>
    %cst_18 = arith.constant 0.000000e+00 : f32
    %24 = vector.broadcast %cst_18 : f32 to vector<128x128xf32>
    %25 = arith.maximumf %23, %24 : vector<128x128xf32>
    %cst_19 = arith.constant dense<0.000000e+00> : vector<128x64xf32>
    %26 = tpu.matmul %25, %10, %cst_19 {dimension_numbers = #tpu.dot_dimension_numbers<[1], [0], [0], [1], [0, 0, 1, 1], [], []>} : vector<128x128xf32>, vector<128x64xf32>, vector<128x64xf32> -> vector<128x64xf32>
    %27 = vector.broadcast %14 : vector<1x64xf32> to vector<128x64xf32>
    %28 = arith.addf %26, %27 : vector<128x64xf32>
    %cst_20 = arith.constant 0.000000e+00 : f32
    %29 = vector.broadcast %cst_20 : f32 to vector<128x64xf32>
    %30 = arith.maximumf %28, %29 : vector<128x64xf32>
    %c0_21 = arith.constant 0 : index
    %c0_22 = arith.constant 0 : index
    %31 = vector.load %arg4[%c0_21, %c0_22] : memref<64x16xf32, #tpu.memory_space<vmem>>, vector<64x16xf32>
    %cst_23 = arith.constant dense<0.000000e+00> : vector<128x16xf32>
    %32 = tpu.matmul %30, %31, %cst_23 {dimension_numbers = #tpu.dot_dimension_numbers<[1], [0], [0], [1], [0, 0, 1, 1], [], []>} : vector<128x64xf32>, vector<64x16xf32>, vector<128x16xf32> -> vector<128x16xf32>
    %33 = vector.broadcast %15 : vector<1x16xf32> to vector<128x16xf32>
    %34 = arith.addf %32, %33 : vector<128x16xf32>
    %35 = vector.extract_strided_slice %34 {offsets = [0, 0], sizes = [128, 8], strides = [1, 1]} : vector<128x16xf32> to vector<128x8xf32>
    %36 = vector.extract_strided_slice %34 {offsets = [0, 8], sizes = [128, 8], strides = [1, 1]} : vector<128x16xf32> to vector<128x8xf32>
    %cst_24 = arith.constant 5.000000e-01 : f32
    %37 = vector.broadcast %cst_24 : f32 to vector<128x8xf32>
    %38 = arith.mulf %37, %36 : vector<128x8xf32>
    %39 = math.exp %38 : vector<128x8xf32>
    %40 = arith.mulf %5, %39 : vector<128x8xf32>
    %41 = arith.addf %35, %40 : vector<128x8xf32>
    %cst_25 = arith.constant dense<0.000000e+00> : vector<128x64xf32>
    %42 = tpu.matmul %41, %11, %cst_25 {dimension_numbers = #tpu.dot_dimension_numbers<[1], [0], [0], [1], [0, 0, 1, 1], [], []>} : vector<128x8xf32>, vector<8x64xf32>, vector<128x64xf32> -> vector<128x64xf32>
    %cst_26 = arith.constant dense<0.000000e+00> : vector<128x64xf32>
    %43 = tpu.matmul %4, %12, %cst_26 {dimension_numbers = #tpu.dot_dimension_numbers<[1], [0], [0], [1], [0, 0, 1, 1], [], []>} : vector<128x32xf32>, vector<32x64xf32>, vector<128x64xf32> -> vector<128x64xf32>
    %44 = arith.addf %42, %43 : vector<128x64xf32>
    %45 = vector.broadcast %16 : vector<1x64xf32> to vector<128x64xf32>
    %46 = arith.addf %44, %45 : vector<128x64xf32>
    %cst_27 = arith.constant 0.000000e+00 : f32
    %47 = vector.broadcast %cst_27 : f32 to vector<128x64xf32>
    %48 = arith.maximumf %46, %47 : vector<128x64xf32>
    %cst_28 = arith.constant dense<0.000000e+00> : vector<128x128xf32>
    %49 = tpu.matmul %48, %9, %cst_28 {dimension_numbers = #tpu.dot_dimension_numbers<[1], [0], [0], [1], [0, 0, 1, 1], [], []>} : vector<128x64xf32>, vector<64x128xf32>, vector<128x128xf32> -> vector<128x128xf32>
    %50 = vector.broadcast %17 : vector<1x128xf32> to vector<128x128xf32>
    %51 = arith.addf %49, %50 : vector<128x128xf32>
    %cst_29 = arith.constant 0.000000e+00 : f32
    %52 = vector.broadcast %cst_29 : f32 to vector<128x128xf32>
    %53 = arith.maximumf %51, %52 : vector<128x128xf32>
    %c0_30 = arith.constant 0 : index
    %c0_31 = arith.constant 0 : index
    %54 = vector.load %arg5[%c0_30, %c0_31] : memref<128x16xf32, #tpu.memory_space<vmem>>, vector<128x16xf32>
    %cst_32 = arith.constant dense<0.000000e+00> : vector<128x16xf32>
    %55 = tpu.matmul %53, %54, %cst_32 {dimension_numbers = #tpu.dot_dimension_numbers<[1], [0], [0], [1], [0, 0, 1, 1], [], []>} : vector<128x128xf32>, vector<128x16xf32>, vector<128x16xf32> -> vector<128x16xf32>
    %56 = vector.broadcast %18 : vector<1x16xf32> to vector<128x16xf32>
    %57 = arith.addf %55, %56 : vector<128x16xf32>
    %58 = tpu.concatenate %57, %34 in 1 : vector<128x16xf32>, vector<128x16xf32> -> vector<128x32xf32>
    %c0_33 = arith.constant 0 : index
    %c0_34 = arith.constant 0 : index
    %59 = vector.load %arg7[%c0_33, %c0_34] : memref<128x32xf32, #tpu.memory_space<vmem>>, vector<128x32xf32>
    tpu.vector_store %arg7[%c0_33, %c0_34], %58 {strides = array<i32>} : memref<128x32xf32, #tpu.memory_space<vmem>>, vector<128x32xf32>,
    return
  }
  func.func @transform_0(%arg0: i32) -> (i32, i32) {
    %c0_i32 = arith.constant 0 : i32
    %c0_i32_0 = arith.constant 0 : i32
    return %arg0, %c0_i32 : i32, i32
  }
  func.func @transform_1(%arg0: i32) -> (i32, i32) {
    %c0_i32 = arith.constant 0 : i32
    %c0_i32_0 = arith.constant 0 : i32
    %c0_i32_1 = arith.constant 0 : i32
    return %c0_i32, %c0_i32_0 : i32, i32
  }
  func.func @transform_2(%arg0: i32) -> (i32, i32) {
    %c0_i32 = arith.constant 0 : i32
    %c0_i32_0 = arith.constant 0 : i32
    %c0_i32_1 = arith.constant 0 : i32
    return %c0_i32, %c0_i32_0 : i32, i32
  }
  func.func @transform_3(%arg0: i32) -> (i32, i32) {
    %c0_i32 = arith.constant 0 : i32
    %c0_i32_0 = arith.constant 0 : i32
    %c0_i32_1 = arith.constant 0 : i32
    return %c0_i32, %c0_i32_0 : i32, i32
  }
  func.func @transform_4(%arg0: i32) -> (i32, i32) {
    %c0_i32 = arith.constant 0 : i32
    %c0_i32_0 = arith.constant 0 : i32
    %c0_i32_1 = arith.constant 0 : i32
    return %c0_i32, %c0_i32_0 : i32, i32
  }
  func.func @transform_5(%arg0: i32) -> (i32, i32) {
    %c0_i32 = arith.constant 0 : i32
    %c0_i32_0 = arith.constant 0 : i32
    %c0_i32_1 = arith.constant 0 : i32
    return %c0_i32, %c0_i32_0 : i32, i32
  }
  func.func @transform_6(%arg0: i32) -> (i32, i32) {
    %c0_i32 = arith.constant 0 : i32
    %c0_i32_0 = arith.constant 0 : i32
    return %arg0, %c0_i32 : i32, i32
  }
}

</mosaic_0001>

<bundles_post_ra>
// kernel: partial_vae_forward.1
= control target key start
LH: loop header
LB: loop body
LE: loop exit
PB: predicated region body
PF: predicated region fallthrough
CT: control target
= control target key end

     0   :  { %s2889_s25 = smov 112   ;;  %vm162_vm0 = vcmask 392192   ;;  %vm340_vm1 = vcmask 130048   ;;  %vm753_vm2 = vcmask 523264   ;;  %vm1187_vm3 = vcmask 261120   ;;  %s2891_s10 = smov 56   ;;  %s3724_s0 = inlined_call_operand.vmem [shape: f32[128,72], index: 0, kind: input, shape index: {}]   ;;  %s3725_s1 = inlined_call_operand.vmem [shape: f32[128,128], index: 1, kind: input, shape index: {}]   ;;  %s3726_s2 = inlined_call_operand.vmem [shape: f32[168,64], index: 2, kind: input, shape index: {}]   ;;  %s3727_s3 = inlined_call_operand.vmem [shape: f32[64,16], index: 3, kind: input, shape index: {}]   ;;  %s3728_s5 = inlined_call_operand.vmem [shape: f32[1,768], index: 5, kind: input, shape index: {}]   ;;  %s3729_s4 = inlined_call_operand.vmem [shape: f32[128,16], index: 4, kind: input, shape index: {}]   ;;  %s3730_s6 = inlined_call_operand.vmem [shape: f32[128,32], index: 6, kind: output, shape index: {}]  }
   0x1   :  { %v2932_v0 = vld [vmem:[%s3724_s0] sm:$0xff]  ;;  %v2937_v1 = vld [vmem:[%s3724_s0 + $0x10] sm:$0xff]  ;;  %v2946_v2 = vld [vmem:[%s3724_s0 + $0x8] sm:$0xff]  ;;  %s2893_s13 = smov 16   ;;  %vm1365_vm4 = vcmask 64512  }
   0x2   :  { %55 = vrot.lane.b32.xlu0 %v2932_v0, %s2889_s25  ;;  %59 = vrot.lane.b32.xlu1 %v2937_v1, %s2889_s25  ;;  %v2951_v3 = vld [vmem:[%s3724_s0 + $0x18] sm:$0xff]  ;;  %v2960_v4 = vld [vmem:[%s3724_s0 + $0x20] sm:$0xff] }
   0x3   :  { %v2965_v5 = vld [vmem:[%s3724_s0 + $0x28] sm:$0xff]  ;;  %v121_v6 = vld [vmem:[%s3725_s1 + $0x10] sm:$0xff]  ;;  %v122_v7 = vld [vmem:[%s3725_s1 + $0x18] sm:$0xff] }
   0x4   :  { %v123_v8 = vld [vmem:[%s3725_s1 + $0x20] sm:$0xff]  ;;  %v2684_v9 = vpack.c.bf16 %v122_v7, %v121_v6  ;;  %v124_v10 = vld [vmem:[%s3725_s1 + $0x28] sm:$0xff]  ;;  %v125_v12 = vld [vmem:[%s3725_s1 + $0x30] sm:$0xff] }
   0x5   :  { %v2688_v11 = vpack.c.bf16 %v124_v10, %v123_v8  ;;  %v126_v13 = vld [vmem:[%s3725_s1 + $0x38] sm:$0xff]  ;;  %v2992_v14 = vld [vmem:[%s3724_s0 + $0x30] sm:$0xff]  ;;  %v119_v17 = vld [vmem:[%s3725_s1] sm:$0xff] }
   0x6   :  { %57 = vrot.lane.b32.xlu0 %v2946_v2, %s2889_s25  ;;  %61 = vrot.lane.b32.xlu1 %v2951_v3, %s2889_s25  ;;  %v2997_v15 = vld [vmem:[%s3724_s0 + $0x38] sm:$0xff]  ;;  %v2692_v16 = vpack.c.bf16 %v126_v13, %v125_v12  ;;  %v120_v18 = vld [vmem:[%s3725_s1 + $0x8] sm:$0xff] }
   0x7   :  { %2685 = vmatprep.subr.bf16.mxu0 %v2684_v9  ;;  %v3012_v19 = vld [vmem:[%s3724_s0 + $0x40] sm:$0xff]  ;;  %v3017_v20 = vld [vmem:[%s3724_s0 + $0x48] sm:$0xff]  ;;  %v2696_v21 = vpack.c.bf16 %v120_v18, %v119_v17  ;;  %v3026_v22 = vld [vmem:[%s3724_s0 + $0x50] sm:$0xff] }
   0x8   :  { %2687 = vmatpush3.bf16.msra.mxu0 %v2684_v9  ;;  %v3031_v23 = vld [vmem:[%s3724_s0 + $0x58] sm:$0xff]  ;;  %v3040_v24 = vld [vmem:[%s3724_s0 + $0x60] sm:$0xff]  ;;  %v3045_v25 = vld [vmem:[%s3724_s0 + $0x68] sm:$0xff] }
   0x9   :  { %2689 = vmatprep.subr.bf16.mxu0 %v2688_v11  ;;  %v3054_v26 = vld [vmem:[%s3724_s0 + $0x70] sm:$0xff]  ;;  %v3059_v27 = vld [vmem:[%s3724_s0 + $0x78] sm:$0xff]  ;;  %v135_v28 = vld [vmem:[%s3726_s2] sm:$0xff] }
   0xa   :  { %63 = vrot.lane.b32.xlu0 %v2960_v4, %s2889_s25  ;;  %65 = vrot.lane.b32.xlu1 %v2965_v5, %s2889_s25  ;;  %v136_v29 = vld [vmem:[%s3726_s2 + $0x8] sm:$0xff]  ;;  %v137_v30 = vld [vmem:[%s3726_s2 + $0x10] sm:$0xff] }
   0xb   :  { %v3074_v31 = vpack.c.bf16 %v136_v29, %v135_v28  ;;  %v138_v32 = vld [vmem:[%s3726_s2 + $0x18] sm:$0xff]  ;;  %v139_v34 = vld [vmem:[%s3726_s2 + $0x20] sm:$0xff]  ;;  %v140_v35 = vld [vmem:[%s3726_s2 + $0x28] sm:$0xff] }
   0xc   :  { %2691 = vmatpush3.bf16.msra.mxu0 %v2688_v11  ;;  %v3079_v33 = vpack.c.bf16 %v138_v32, %v137_v30  ;;  %v3090_v36 = vpack.c.bf16 %v140_v35, %v139_v34  ;;  %v141_v37 = vld [vmem:[%s3726_s2 + $0x30] sm:$0xff]  ;;  %v142_v38 = vld [vmem:[%s3726_s2 + $0x38] sm:$0xff]  ;;  %v143_v40 = vld [vmem:[%s3726_s2 + $0x40] sm:$0xff] }
   0xd   :  { %2693 = vmatprep.subr.bf16.mxu0 %v2692_v16  ;;  %2804 = vmatprep.subr.bf16.mxu1 %v3074_v31  ;;  %v3100_v39 = vpack.c.bf16 %v142_v38, %v141_v37  ;;  %v144_v41 = vld [vmem:[%s3726_s2 + $0x48] sm:$0xff]  ;;  %v145_v43 = vld [vmem:[%s3726_s2 + $0x50] sm:$0xff]  ;;  %v146_v44 = vld [vmem:[%s3726_s2 + $0x58] sm:$0xff] }
   0xe   :  { %67 = vrot.lane.b32.xlu0 %v2992_v14, %s2889_s25  ;;  %69 = vrot.lane.b32.xlu1 %v2997_v15, %s2889_s25  ;;  %v3110_v42 = vpack.c.bf16 %v144_v41, %v143_v40  ;;  %v3120_v45 = vpack.c.bf16 %v146_v44, %v145_v43  ;;  %v147_v46 = vld [vmem:[%s3726_s2 + $0x60] sm:$0xff]  ;;  %v148_v47 = vld [vmem:[%s3726_s2 + $0x68] sm:$0xff] }
   0xf   :  { %2812 = vmatpush3.bf16.msra.mxu1 %v3074_v31  ;;  %v3130_v48 = vpack.c.bf16 %v148_v47, %v147_v46  ;;  %v150_v34 = vld [vmem:[%s3726_s2 + $0x78] sm:$0xff]  ;;  %v740_v37 = vld [vmem:[%s3727_s3 + $0x8] sm:$0xff] }
  0x10   :  { %2695 = vmatpush3.bf16.msra.mxu0 %v2692_v16  ;;  %2805 = vmatprep.subr.bf16.mxu1 %v3079_v33 }
  0x11   :  { %2697 = vmatprep.subr.bf16.mxu0 %v2696_v21 }
  0x12   :  { %71 = vrot.lane.b32.xlu0 %v3012_v19, %s2889_s25  ;;  %73 = vrot.lane.b32.xlu1 %v3017_v20, %s2889_s25 }
  0x13   :  { %2813 = vmatpush3.bf16.msra.mxu1 %v3079_v33 }
  0x14   :  { %2806 = vmatprep.subr.bf16.mxu1 %v3090_v36 }
  0x16   :  { %75 = vrot.lane.b32.xlu0 %v3026_v22, %s2889_s25  ;;  %77 = vrot.lane.b32.xlu1 %v3031_v23, %s2889_s25 }
  0x17   :  { %2814 = vmatpush3.bf16.msra.mxu1 %v3090_v36 }
  0x18   :  { %2807 = vmatprep.subr.bf16.mxu1 %v3100_v39 }
  0x1a   :  { %79 = vrot.lane.b32.xlu0 %v3040_v24, %s2889_s25  ;;  %81 = vrot.lane.b32.xlu1 %v3045_v25, %s2889_s25 }
  0x1b   :  { %2815 = vmatpush3.bf16.msra.mxu1 %v3100_v39 }
  0x1c   :  { %2808 = vmatprep.subr.bf16.mxu1 %v3110_v42 }
  0x1e   :  { %83 = vrot.lane.b32.xlu0 %v3054_v26, %s2889_s25  ;;  %85 = vrot.lane.b32.xlu1 %v3059_v27, %s2889_s25 }
  0x1f   :  { %2816 = vmatpush3.bf16.msra.mxu1 %v3110_v42 }
  0x20   :  { %2809 = vmatprep.subr.bf16.mxu1 %v3120_v45 }
  0x23   :  { %2817 = vmatpush3.bf16.msra.mxu1 %v3120_v45 }
  0x24   :  { %2810 = vmatprep.subr.bf16.mxu1 %v3130_v48 }
  0x27   :  { %2818 = vmatpush3.bf16.msra.mxu1 %v3130_v48 }
  0x74   :  { %v56_v49 = vpop.permute.xlu0 %55  ;;  %v60_v50 = vpop.permute.xlu1 %59 }
  0x75   :  { %2382 = vmatprep.mubr.msk.f32.mxu0 %vm162_vm0, %v56_v49  ;;  %v103_v7 = vmul.f32 %v56_v49, %v2932_v0  ;;  %v105_v9 = vmul.f32 %v60_v50, %v2937_v1 }
  0x78   :  { %v58_v51 = vpop.permute.xlu0 %57  ;;  %v62_v52 = vpop.permute.xlu1 %61 }
  0x79   :  { %2383 = vmatmul.mubr.msk.f32.vlgmr.msra.gmra.mrb[0].mxu0 %vm162_vm0, %v58_v51  ;;  %v104_v8 = vmul.f32 %v58_v51, %v2946_v2  ;;  %v106_v10 = vmul.f32 %v62_v52, %v2951_v3 }
  0x7a   :  { %2699 = vmatpush3.bf16.msra.mxu0 %v2696_v21  ;;  %2385 = vmatprep.mubr.msk.f32.mxu0 %vm162_vm0, %v60_v50 }
  0x7b   :  { %2701 = vmatprep.subr.bf16.mxu0 %v3074_v31 }
  0x7c   :  { %v64_v53 = vpop.permute.xlu0 %63  ;;  %v66_v54 = vpop.permute.xlu1 %65 }
  0x7d   :  { %2386 = vmatmul.mubr.msk.f32.gmra.mrb[2].mxu0 %vm162_vm0, %v62_v52  ;;  %v107_v11 = vmul.f32 %v64_v53, %v2960_v4  ;;  %v108_v12 = vmul.f32 %v66_v54, %v2965_v5 }
  0x7e   :  { %2388 = vmatprep.mubr.msk.f32.mxu0 %vm162_vm0, %v64_v53 }
  0x80   :  { %v68_v55 = vpop.permute.xlu0 %67  ;;  %v70_v56 = vpop.permute.xlu1 %69 }
  0x81   :  { %2389 = vmatmul.mubr.msk.f32.gmra.mrb[4].mxu0 %vm162_vm0, %v66_v54  ;;  %v109_v13 = vmul.f32 %v68_v55, %v2992_v14  ;;  %v110_v16 = vmul.f32 %v70_v56, %v2997_v15 }
  0x82   :  { %2391 = vmatprep.mubr.msk.f32.mxu0 %vm162_vm0, %v68_v55 }
  0x84   :  { %v72_v57 = vpop.permute.xlu0 %71  ;;  %v74_v58 = vpop.permute.xlu1 %73 }
  0x85   :  { %2392 = vmatmul.mubr.msk.f32.gmra.mrb[6].mxu0 %vm162_vm0, %v70_v56  ;;  %v111_v17 = vmul.f32 %v72_v57, %v3012_v19  ;;  %v112_v18 = vmul.f32 %v74_v58, %v3017_v20  ;;  %v741_v56 = vld [vmem:[%s3727_s3 + $0x10] sm:$0xff] }
  0x86   :  { %2394 = vmatprep.mubr.msk.f32.mxu0 %vm162_vm0, %v72_v57  ;;  %v742_v57 = vld [vmem:[%s3727_s3 + $0x18] sm:$0xff] }
  0x88   :  { %v76_v59 = vpop.permute.xlu0 %75  ;;  %v78_v60 = vpop.permute.xlu1 %77 }
  0x89   :  { %2395 = vmatmul.mubr.msk.f32.gmra.mrb[8].mxu0 %vm162_vm0, %v74_v58  ;;  %v113_v21 = vmul.f32 %v76_v59, %v3026_v22  ;;  %v114_v28 = vmul.f32 %v78_v60, %v3031_v23 }
  0x8a   :  { %2397 = vmatprep.mubr.msk.f32.mxu0 %vm162_vm0, %v76_v59 }
  0x8c   :  { %v80_v61 = vpop.permute.xlu0 %79  ;;  %v82_v62 = vpop.permute.xlu1 %81 }
  0x8d   :  { %2398 = vmatmul.mubr.msk.f32.gmra.mrb[10].mxu0 %vm162_vm0, %v78_v60  ;;  %v115_v29 = vmul.f32 %v80_v61, %v3040_v24  ;;  %v116_v30 = vmul.f32 %v82_v62, %v3045_v25 }
  0x8e   :  { %2400 = vmatprep.mubr.msk.f32.mxu0 %vm162_vm0, %v80_v61 }
  0x90   :  { %v84_v63 = vpop.permute.xlu0 %83  ;;  %v86_v6 = vpop.permute.xlu1 %85 }
  0x91   :  { %2401 = vmatmul.mubr.msk.f32.gmra.mrb[12].mxu0 %vm162_vm0, %v82_v62  ;;  %v118_v32 = vmul.f32 %v86_v6, %v3059_v27 }
  0x92   :  { %2403 = vmatprep.mubr.msk.f32.mxu0 %vm162_vm0, %v84_v63 }
  0x95   :  { %2404 = vmatmul.mubr.msk.f32.gmra.mrb[14].mxu0 %vm162_vm0, %v86_v6 }
  0x96   :  { %2410 = vmatprep.mubr.msk.f32.mxu0 %vm340_vm1, %v103_v7  ;;  %v743_v7 = vld [vmem:[%s3727_s3 + $0x20] sm:$0xff] }
  0x99   :  { %2411 = vmatmul.mubr.msk.f32.vlgmr.msra.gmra.mrb[0].mxu0 %vm340_vm1, %v104_v8  ;;  %v744_v8 = vld [vmem:[%s3727_s3 + $0x28] sm:$0xff] }
  0x9a   :  { %2413 = vmatprep.mubr.msk.f32.mxu0 %vm340_vm1, %v105_v9  ;;  %2703 = vmatpush3.bf16.msra.mxu0 %v3074_v31  ;;  %v117_v31 = vmul.f32 %v84_v63, %v3054_v26  ;;  %v2736_v63 = vpack.c.bf16 %v742_v57, %v741_v56 }
  0x9b   :  { %2705 = vmatprep.subr.bf16.mxu0 %v3079_v33 }
  0x9d   :  { %2414 = vmatmul.mubr.msk.f32.gmra.mrb[2].mxu0 %vm340_vm1, %v106_v10 }
  0x9e   :  { %2416 = vmatprep.mubr.msk.f32.mxu0 %vm340_vm1, %v107_v11  ;;  %2707 = vmatpush3.bf16.msra.mxu0 %v3079_v33  ;;  %v149_v33 = vld [vmem:[%s3726_s2 + $0x70] sm:$0xff] }
  0x9f   :  { %2709 = vmatprep.subr.bf16.mxu0 %v3090_v36  ;;  %v2728_v35 = vpack.c.bf16 %v150_v34, %v149_v33 }
  0xa1   :  { %2417 = vmatmul.mubr.msk.f32.gmra.mrb[4].mxu0 %vm340_vm1, %v108_v12  ;;  %2811 = vmatprep.subr.bf16.mxu1 %v2728_v35 }
  0xa2   :  { %2419 = vmatprep.mubr.msk.f32.mxu0 %vm340_vm1, %v109_v13  ;;  %2711 = vmatpush3.bf16.msra.mxu0 %v3090_v36  ;;  %v739_v36 = vld [vmem:[%s3727_s3] sm:$0xff] }
  0xa3   :  { %2713 = vmatprep.subr.bf16.mxu0 %v3100_v39  ;;  %2819 = vmatpush3.bf16.msra.mxu1 %v2728_v35  ;;  %v2732_v38 = vpack.c.bf16 %v740_v37, %v739_v36 }
  0xa5   :  { %2420 = vmatmul.mubr.msk.f32.gmra.mrb[6].mxu0 %vm340_vm1, %v110_v16  ;;  %2733 = vmatprep.subr.bf16.mxu1 %v2732_v38  ;;  %v2740_v16 = vpack.c.bf16 %v744_v8, %v743_v7 }
  0xa6   :  { %2422 = vmatprep.mubr.msk.f32.mxu0 %vm340_vm1, %v111_v17  ;;  %2715 = vmatpush3.bf16.msra.mxu0 %v3100_v39  ;;  %v3212_v39 = vld [vmem:[%s3728_s5] ss:$0 sm:$0xff] }
  0xa7   :  { %2717 = vmatprep.subr.bf16.mxu0 %v3110_v42 }
  0xa9   :  { %2423 = vmatmul.mubr.msk.f32.gmra.mrb[8].mxu0 %vm340_vm1, %v112_v18 }
  0xaa   :  { %2425 = vmatprep.mubr.msk.f32.mxu0 %vm340_vm1, %v113_v21  ;;  %2719 = vmatpush3.bf16.msra.mxu0 %v3110_v42 }
  0xab   :  { %2721 = vmatprep.subr.bf16.mxu0 %v3120_v45 }
  0xad   :  { %2426 = vmatmul.mubr.msk.f32.gmra.mrb[10].mxu0 %vm340_vm1, %v114_v28 }
  0xae   :  { %2428 = vmatprep.mubr.msk.f32.mxu0 %vm340_vm1, %v115_v29  ;;  %2723 = vmatpush3.bf16.msra.mxu0 %v3120_v45 }
  0xaf   :  { %2725 = vmatprep.subr.bf16.mxu0 %v3130_v48 }
  0xb1   :  { %2429 = vmatmul.mubr.msk.f32.gmra.mrb[12].mxu0 %vm340_vm1, %v116_v30 }
  0xb2   :  { %2431 = vmatprep.mubr.msk.f32.mxu0 %vm340_vm1, %v117_v31  ;;  %2727 = vmatpush3.bf16.msra.mxu0 %v3130_v48 }
  0xb3   :  { %2729 = vmatprep.subr.bf16.mxu0 %v2728_v35 }
  0xb5   :  { %2432 = vmatmul.mubr.msk.f32.gmra.mrb[14].mxu0 %vm340_vm1, %v118_v32 }
  0xb6   :  { %2731 = vmatpush3.bf16.msra.mxu0 %v2728_v35 }
 0x16c   :  { %v2412_v40 = vpop.f32.mrb[0].mxu0 }
 0x16d   :  { %v541_v41 = vadd.f32 %v2412_v40, %v3212_v39  ;;  %v455_v42 = vpop.f32.mrb[1].mxu0 }
 0x16e   :  { %v540_v43 = vadd.f32 %v3212_v39, %v455_v42 }
 0x16f   :  { %v557_v46 = vmax.f32 %v541_v41, 0.0 }
 0x170   :  { %v556_v44 = vmax.f32 %v540_v43, 0.0  ;;  %v2415_v45 = vpop.f32.mrb[2].mxu0 }
 0x171   :  { %v543_v47 = vadd.f32 %v2415_v45, %v3212_v39  ;;  %v465_v48 = vpop.f32.mrb[3].mxu0 }
 0x172   :  { %v542_v49 = vadd.f32 %v3212_v39, %v465_v48  ;;  %2466 = vmatprep.mubr.f32.mxu0 %v556_v44  ;;  %v746_v48 = vld [vmem:[%s3727_s3 + $0x38] sm:$0xff] }
 0x173   :  { %2467 = vmatmul.mubr.f32.vlgmr.msra.gmra.mrb[16].mxu0 %v557_v46  ;;  %v559_v52 = vmax.f32 %v543_v47, 0.0  ;;  %v745_v47 = vld [vmem:[%s3727_s3 + $0x30] sm:$0xff]  ;;  %s2890_s3 = smov 96  }
 0x174   :  { %v558_v50 = vmax.f32 %v542_v49, 0.0  ;;  %v2418_v51 = vpop.f32.mrb[4].mxu0  ;;  %v2744_v49 = vpack.c.bf16 %v746_v48, %v745_v47  ;;  %1157 = vrot.lane.b32.xlu1 %v2946_v2, %s2890_s3  ;;  %1155 = vrot.lane.b32.xlu0 %v2932_v0, %s2890_s3 }
 0x175   :  { %v545_v53 = vadd.f32 %v2418_v51, %v3212_v39  ;;  %v475_v54 = vpop.f32.mrb[5].mxu0 }
 0x176   :  { %2469 = vmatprep.mubr.f32.mxu0 %v558_v50  ;;  %v544_v55 = vadd.f32 %v3212_v39, %v475_v54 }
 0x177   :  { %2470 = vmatmul.mubr.f32.gmra.mrb[18].mxu0 %v559_v52  ;;  %v561_v60 = vmax.f32 %v545_v53, 0.0 }
 0x178   :  { %v2421_v58 = vpop.f32.mrb[6].mxu0  ;;  %v560_v59 = vmax.f32 %v544_v55, 0.0 }
 0x179   :  { %v547_v61 = vadd.f32 %v2421_v58, %v3212_v39  ;;  %v485_v62 = vpop.f32.mrb[7].mxu0 }
 0x17a   :  { %v546_v6 = vadd.f32 %v3212_v39, %v485_v62  ;;  %2472 = vmatprep.mubr.f32.mxu1 %v560_v59 }
 0x17b   :  { %2473 = vmatmul.mubr.f32.vlgmr.msra.gmra.mrb[0].mxu1 %v561_v60  ;;  %v563_v11 = vmax.f32 %v547_v61, 0.0 }
 0x17c   :  { %v562_v9 = vmax.f32 %v546_v6, 0.0  ;;  %v2424_v10 = vpop.f32.mrb[8].mxu0  ;;  %2735 = vmatpush3.bf16.msra.mxu1 %v2732_v38 }
 0x17d   :  { %v549_v12 = vadd.f32 %v2424_v10, %v3212_v39  ;;  %v495_v13 = vpop.f32.mrb[9].mxu0  ;;  %2737 = vmatprep.subr.bf16.mxu1 %v2736_v63 }
 0x17e   :  { %v548_v17 = vadd.f32 %v3212_v39, %v495_v13  ;;  %2475 = vmatprep.mubr.f32.mxu1 %v562_v9 }
 0x17f   :  { %2476 = vmatmul.mubr.f32.gmra.mrb[2].mxu1 %v563_v11  ;;  %v565_v28 = vmax.f32 %v549_v12, 0.0 }
 0x180   :  { %v564_v18 = vmax.f32 %v548_v17, 0.0  ;;  %v2427_v21 = vpop.f32.mrb[10].mxu0  ;;  %2739 = vmatpush3.bf16.msra.mxu1 %v2736_v63 }
 0x181   :  { %v551_v29 = vadd.f32 %v2427_v21, %v3212_v39  ;;  %v505_v30 = vpop.f32.mrb[11].mxu0  ;;  %2741 = vmatprep.subr.bf16.mxu1 %v2740_v16 }
 0x182   :  { %v550_v31 = vadd.f32 %v3212_v39, %v505_v30  ;;  %2478 = vmatprep.mubr.f32.mxu1 %v564_v18 }
 0x183   :  { %2479 = vmatmul.mubr.f32.gmra.mrb[4].mxu1 %v565_v28  ;;  %v567_v34 = vmax.f32 %v551_v29, 0.0 }
 0x184   :  { %v566_v32 = vmax.f32 %v550_v31, 0.0  ;;  %v2430_v33 = vpop.f32.mrb[12].mxu0  ;;  %2743 = vmatpush3.bf16.msra.mxu1 %v2740_v16 }
 0x185   :  { %v553_v35 = vadd.f32 %v2430_v33, %v3212_v39  ;;  %v515_v36 = vpop.f32.mrb[13].mxu0  ;;  %2745 = vmatprep.subr.bf16.mxu1 %v2744_v49 }
 0x186   :  { %v552_v37 = vadd.f32 %v3212_v39, %v515_v36  ;;  %2481 = vmatprep.mubr.f32.mxu1 %v566_v32 }
 0x187   :  { %2482 = vmatmul.mubr.f32.gmra.mrb[6].mxu1 %v567_v34  ;;  %v569_v41 = vmax.f32 %v553_v35, 0.0 }
 0x188   :  { %v568_v38 = vmax.f32 %v552_v37, 0.0  ;;  %v2433_v40 = vpop.f32.mrb[14].mxu0  ;;  %2747 = vmatpush3.bf16.msra.mxu1 %v2744_v49 }
 0x189   :  { %v555_v42 = vadd.f32 %v2433_v40, %v3212_v39  ;;  %v525_v43 = vpop.f32.mrb[15].mxu0 }
 0x18a   :  { %v554_v44 = vadd.f32 %v3212_v39, %v525_v43  ;;  %2484 = vmatprep.mubr.f32.mxu1 %v568_v38  ;;  %v2112_v39 = vld [vmem:[%s3728_s5 + $0x1] ss:$0 sm:$0xff] }
 0x18b   :  { %2485 = vmatmul.mubr.f32.gmra.mrb[8].mxu1 %v569_v41  ;;  %v571_v46 = vmax.f32 %v555_v42, 0.0 }
 0x18c   :  { %v570_v45 = vmax.f32 %v554_v44, 0.0 }
 0x18e   :  { %2487 = vmatprep.mubr.f32.mxu1 %v570_v45 }
 0x18f   :  { %2488 = vmatmul.mubr.f32.gmra.mrb[10].mxu1 %v571_v46 }
 0x246   :  { %v2468_v50 = vpop.f32.mrb[16].mxu0 }
 0x247   :  { %v650_v51 = vadd.f32 %v2468_v50, %v2112_v39  ;;  %v644_v52 = vpop.f32.mrb[17].mxu0 }
 0x248   :  { %v645_v53 = vadd.f32 %v2112_v39, %v644_v52 }
 0x249   :  { %v724_v56 = vmax.f32 %v650_v51, 0.0  ;;  %v153_v51 = vld [vmem:[%s3726_s2 + $0x90] sm:$0xff] }
 0x24a   :  { %v723_v54 = vmax.f32 %v645_v53, 0.0  ;;  %v2471_v55 = vpop.f32.mrb[18].mxu0  ;;  %v154_v53 = vld [vmem:[%s3726_s2 + $0x98] sm:$0xff] }
 0x24b   :  { %v660_v57 = vadd.f32 %v2471_v55, %v2112_v39  ;;  %v654_v58 = vpop.f32.mrb[19].mxu0 }
 0x24c   :  { %v655_v59 = vadd.f32 %v2112_v39, %v654_v58  ;;  %2506 = vmatprep.mubr.msk.f32.mxu1 %vm753_vm2, %v723_v54  ;;  %v155_v54 = vld [vmem:[%s3726_s2 + $0xa0] sm:$0xff] }
 0x24d   :  { %2507 = vmatmul.mubr.msk.f32.vlgmr.msra.gmra.mrb[12].mxu1 %vm753_vm2, %v724_v56  ;;  %v726_v62 = vmax.f32 %v660_v57, 0.0  ;;  %v2752_v55 = vpack.c.bf16 %v155_v54, %v154_v53  ;;  %v3286_v56 = vld [vmem:[%s3728_s5 + $0x2] ss:$0 sm:$0xff] }
 0x24e   :  { %v725_v60 = vmax.f32 %v655_v59, 0.0  ;;  %v2474_v61 = vpop.f32.mrb[0].mxu1 }
 0x24f   :  { %v670_v63 = vadd.f32 %v2474_v61, %v2112_v39  ;;  %v664_v6 = vpop.f32.mrb[1].mxu1 }
 0x250   :  { %v665_v7 = vadd.f32 %v2112_v39, %v664_v6  ;;  %2509 = vmatprep.mubr.msk.f32.mxu1 %vm753_vm2, %v725_v60  ;;  %v1156_v60 = vpop.permute.xlu0 %1155 }
 0x251   :  { %2510 = vmatmul.mubr.msk.f32.gmra.mrb[14].mxu1 %vm753_vm2, %v726_v62  ;;  %v728_v10 = vmax.f32 %v670_v63, 0.0  ;;  %v1158_v62 = vpop.permute.xlu1 %1157  ;;  %2538 = vmatprep.mubr.msk.f32.mxu0 %vm1187_vm3, %v1156_v60 }
 0x252   :  { %v727_v8 = vmax.f32 %v665_v7, 0.0  ;;  %v2477_v9 = vpop.f32.mrb[2].mxu1 }
 0x253   :  { %v680_v11 = vadd.f32 %v2477_v9, %v2112_v39  ;;  %v674_v12 = vpop.f32.mrb[3].mxu1 }
 0x254   :  { %v675_v13 = vadd.f32 %v2112_v39, %v674_v12  ;;  %2512 = vmatprep.mubr.msk.f32.mxu1 %vm753_vm2, %v727_v8 }
 0x255   :  { %2513 = vmatmul.mubr.msk.f32.gmra.mrb[16].mxu1 %vm753_vm2, %v728_v10  ;;  %v730_v18 = vmax.f32 %v680_v11, 0.0 }
 0x256   :  { %v729_v16 = vmax.f32 %v675_v13, 0.0  ;;  %v2480_v17 = vpop.f32.mrb[4].mxu1 }
 0x257   :  { %v690_v21 = vadd.f32 %v2480_v17, %v2112_v39  ;;  %v684_v28 = vpop.f32.mrb[5].mxu1 }
 0x258   :  { %v685_v29 = vadd.f32 %v2112_v39, %v684_v28  ;;  %2515 = vmatprep.mubr.msk.f32.mxu1 %vm753_vm2, %v729_v16 }
 0x259   :  { %2516 = vmatmul.mubr.msk.f32.gmra.mrb[18].mxu1 %vm753_vm2, %v730_v18  ;;  %v732_v32 = vmax.f32 %v690_v21, 0.0 }
 0x25a   :  { %v731_v30 = vmax.f32 %v685_v29, 0.0  ;;  %v2483_v31 = vpop.f32.mrb[6].mxu1 }
 0x25b   :  { %v700_v33 = vadd.f32 %v2483_v31, %v2112_v39  ;;  %v694_v34 = vpop.f32.mrb[7].mxu1 }
 0x25c   :  { %v695_v35 = vadd.f32 %v2112_v39, %v694_v34  ;;  %2518 = vmatprep.mubr.msk.f32.mxu1 %vm753_vm2, %v731_v30 }
 0x25d   :  { %2519 = vmatmul.mubr.msk.f32.gmra.mrb[20].mxu1 %vm753_vm2, %v732_v32  ;;  %v734_v38 = vmax.f32 %v700_v33, 0.0 }
 0x25e   :  { %v733_v36 = vmax.f32 %v695_v35, 0.0  ;;  %v2486_v37 = vpop.f32.mrb[8].mxu1 }
 0x25f   :  { %v710_v40 = vadd.f32 %v2486_v37, %v2112_v39  ;;  %v704_v41 = vpop.f32.mrb[9].mxu1 }
 0x260   :  { %v705_v42 = vadd.f32 %v2112_v39, %v704_v41  ;;  %2521 = vmatprep.mubr.msk.f32.mxu1 %vm753_vm2, %v733_v36 }
 0x261   :  { %2522 = vmatmul.mubr.msk.f32.gmra.mrb[22].mxu1 %vm753_vm2, %v734_v38  ;;  %v736_v45 = vmax.f32 %v710_v40, 0.0 }
 0x262   :  { %v735_v43 = vmax.f32 %v705_v42, 0.0  ;;  %v2489_v44 = vpop.f32.mrb[10].mxu1 }
 0x263   :  { %v720_v46 = vadd.f32 %v2489_v44, %v2112_v39  ;;  %v714_v47 = vpop.f32.mrb[11].mxu1 }
 0x264   :  { %v715_v48 = vadd.f32 %v2112_v39, %v714_v47  ;;  %2524 = vmatprep.mubr.msk.f32.mxu1 %vm753_vm2, %v735_v43  ;;  %v152_v39 = vld [vmem:[%s3726_s2 + $0x88] sm:$0xff] }
 0x265   :  { %2525 = vmatmul.mubr.msk.f32.gmra.mrb[24].mxu1 %vm753_vm2, %v736_v45  ;;  %v738_v50 = vmax.f32 %v720_v46, 0.0  ;;  %v2748_v52 = vpack.c.bf16 %v153_v51, %v152_v39 }
 0x266   :  { %v737_v49 = vmax.f32 %v715_v48, 0.0 }
 0x267   :  { %2749 = vmatprep.subr.bf16.mxu0 %v2748_v52 }
 0x268   :  { %2527 = vmatprep.mubr.msk.f32.mxu1 %vm753_vm2, %v737_v49  ;;  %2751 = vmatpush3.bf16.msra.mxu0 %v2748_v52 }
 0x269   :  { %2528 = vmatmul.mubr.msk.f32.gmra.mrb[26].mxu1 %vm753_vm2, %v738_v50  ;;  %2753 = vmatprep.subr.bf16.mxu0 %v2752_v55 }
 0x26c   :  { %2755 = vmatpush3.bf16.msra.mxu0 %v2752_v55 }
 0x26f   :  { %2539 = vmatmul.mubr.msk.f32.vlgmr.msra.gmra.mrb[20].mxu0 %vm1187_vm3, %v1158_v62 }
 0x320   :  { %v2508_v57 = vpop.f32.mrb[12].mxu1 }
 0x321   :  { %v3289_v58 = vadd.f32 %v2508_v57, %v3286_v56  ;;  %v868_v59 = vpop.f32.mrb[13].mxu1 }
 0x322   :  { %v3292_v61 = vadd.f32 %v3286_v56, %v868_v59 }
 0x323   :  { %v948_v63 = vmul.f32 0.5, %v3289_v58 }
 0x324   :  { %v947_v6 = vmul.f32 0.5, %v3292_v61  ;;  %v2511_v7 = vpop.f32.mrb[14].mxu1 }
 0x325   :  { %v965_v8 = vmul.f32 1.442695, %v948_v63  ;;  %v3299_v9 = vadd.f32 %v2511_v7, %v3286_v56  ;;  %v878_v10 = vpop.f32.mrb[15].mxu1 }
 0x326   :  { %v963_v11 = vmul.f32 1.442695, %v947_v6  ;;  %v3302_v12 = vadd.f32 %v3286_v56, %v878_v10 }
 0x327   :  { %2857 = vpow2.f32 %v965_v8  ;;  %v950_v13 = vmul.f32 0.5, %v3299_v9 }
 0x328   :  { %2859 = vpow2.f32 %v963_v11  ;;  %v949_v16 = vmul.f32 0.5, %v3302_v12  ;;  %v2514_v17 = vpop.f32.mrb[16].mxu1 }
 0x329   :  { %v969_v18 = vmul.f32 1.442695, %v950_v13  ;;  %v3307_v21 = vadd.f32 %v2514_v17, %v3286_v56  ;;  %v888_v28 = vpop.f32.mrb[17].mxu1 }
 0x32a   :  { %v967_v29 = vmul.f32 1.442695, %v949_v16  ;;  %v3310_v30 = vadd.f32 %v3286_v56, %v888_v28 }
 0x32b   :  { %2861 = vpow2.f32 %v969_v18  ;;  %v952_v31 = vmul.f32 0.5, %v3307_v21 }
 0x32c   :  { %2863 = vpow2.f32 %v967_v29  ;;  %v951_v32 = vmul.f32 0.5, %v3310_v30  ;;  %v2517_v33 = vpop.f32.mrb[18].mxu1 }
 0x32d   :  { %v973_v34 = vmul.f32 1.442695, %v952_v31  ;;  %v3315_v35 = vadd.f32 %v2517_v33, %v3286_v56  ;;  %v898_v36 = vpop.f32.mrb[19].mxu1 }
 0x32e   :  { %v971_v37 = vmul.f32 1.442695, %v951_v32  ;;  %v3318_v38 = vadd.f32 %v3286_v56, %v898_v36 }
 0x32f   :  { %2865 = vpow2.f32 %v973_v34  ;;  %v954_v40 = vmul.f32 0.5, %v3315_v35 }
 0x330   :  { %2867 = vpow2.f32 %v971_v37  ;;  %v953_v41 = vmul.f32 0.5, %v3318_v38  ;;  %v2520_v42 = vpop.f32.mrb[20].mxu1 }
 0x331   :  { %v2858_v43 = vpop.eup %2857  ;;  %v977_v44 = vmul.f32 1.442695, %v954_v40  ;;  %v3323_v45 = vadd.f32 %v2520_v42, %v3286_v56  ;;  %v908_v46 = vpop.f32.mrb[21].mxu1 }
 0x332   :  { %v2860_v47 = vpop.eup %2859  ;;  %v975_v48 = vmul.f32 1.442695, %v953_v41  ;;  %v3326_v49 = vadd.f32 %v3286_v56, %v908_v46  ;;  %1013 = vrot.lane.b32.xlu1 %v2858_v43, %s2891_s10 }
 0x333   :  { %2869 = vpow2.f32 %v977_v44  ;;  %v956_v50 = vmul.f32 0.5, %v3323_v45  ;;  %1011 = vrot.lane.b32.xlu0 %v2860_v47, %s2891_s10 }
 0x334   :  { %2871 = vpow2.f32 %v975_v48  ;;  %v955_v39 = vmul.f32 0.5, %v3326_v49  ;;  %v2523_v51 = vpop.f32.mrb[22].mxu1 }
 0x335   :  { %v2862_v52 = vpop.eup %2861  ;;  %v981_v53 = vmul.f32 1.442695, %v956_v50  ;;  %v3333_v54 = vadd.f32 %v2523_v51, %v3286_v56  ;;  %v918_v55 = vpop.f32.mrb[23].mxu1 }
 0x336   :  { %v2864_v57 = vpop.eup %2863  ;;  %v979_v59 = vmul.f32 1.442695, %v955_v39  ;;  %v3336_v60 = vadd.f32 %v3286_v56, %v918_v55  ;;  %1017 = vrot.lane.b32.xlu1 %v2862_v52, %s2891_s10 }
 0x337   :  { %2873 = vpow2.f32 %v981_v53  ;;  %v958_v62 = vmul.f32 0.5, %v3333_v54  ;;  %1015 = vrot.lane.b32.xlu0 %v2864_v57, %s2891_s10  ;;  %v151_v53 = vld [vmem:[%s3726_s2 + $0x80] sm:$0xff]  ;;  %s2892_s2 = smov 64  }
 0x338   :  { %2875 = vpow2.f32 %v979_v59  ;;  %v957_v63 = vmul.f32 0.5, %v3336_v60  ;;  %v2526_v6 = vpop.f32.mrb[24].mxu1  ;;  %2562 = vmatprep.subr.mxu0 %v151_v53 }
 0x339   :  { %v2866_v7 = vpop.eup %2865  ;;  %v985_v8 = vmul.f32 1.442695, %v958_v62  ;;  %v3343_v10 = vadd.f32 %v2526_v6, %v3286_v56  ;;  %v928_v11 = vpop.f32.mrb[25].mxu1  ;;  %2563 = vmatpush3.msra.mxu0 %v151_v53 }
 0x33a   :  { %v2868_v13 = vpop.eup %2867  ;;  %v983_v16 = vmul.f32 1.442695, %v957_v63  ;;  %v3346_v17 = vadd.f32 %v3286_v56, %v928_v11  ;;  %1021 = vrot.lane.b32.xlu1 %v2866_v7, %s2891_s10 }
 0x33b   :  { %2877 = vpow2.f32 %v985_v8  ;;  %v960_v18 = vmul.f32 0.5, %v3343_v10  ;;  %1019 = vrot.lane.b32.xlu0 %v2868_v13, %s2891_s10 }
 0x33c   :  { %2879 = vpow2.f32 %v983_v16  ;;  %v959_v28 = vmul.f32 0.5, %v3346_v17  ;;  %v2529_v29 = vpop.f32.mrb[26].mxu1 }
 0x33d   :  { %v2870_v31 = vpop.eup %2869  ;;  %v989_v32 = vmul.f32 1.442695, %v960_v18  ;;  %v3353_v33 = vadd.f32 %v2529_v29, %v3286_v56  ;;  %v938_v34 = vpop.f32.mrb[27].mxu1 }
 0x33e   :  { %v2872_v36 = vpop.eup %2871  ;;  %v987_v37 = vmul.f32 1.442695, %v959_v28  ;;  %v3356_v40 = vadd.f32 %v3286_v56, %v938_v34  ;;  %1025 = vrot.lane.b32.xlu1 %v2870_v31, %s2891_s10 }
 0x33f   :  { %2881 = vpow2.f32 %v989_v32  ;;  %v962_v41 = vmul.f32 0.5, %v3353_v33  ;;  %1023 = vrot.lane.b32.xlu0 %v2872_v36, %s2891_s10 }
 0x340   :  { %2883 = vpow2.f32 %v987_v37  ;;  %v961_v42 = vmul.f32 0.5, %v3356_v40 }
 0x341   :  { %v2874_v43 = vpop.eup %2873  ;;  %v993_v44 = vmul.f32 1.442695, %v962_v41 }
 0x342   :  { %v2876_v46 = vpop.eup %2875  ;;  %v991_v47 = vmul.f32 1.442695, %v961_v42  ;;  %1029 = vrot.lane.b32.xlu1 %v2874_v43, %s2891_s10 }
 0x343   :  { %2885 = vpow2.f32 %v993_v44  ;;  %1027 = vrot.lane.b32.xlu0 %v2876_v46, %s2891_s10 }
 0x344   :  { %2887 = vpow2.f32 %v991_v47 }
 0x345   :  { %v2878_v56 = vpop.eup %2877 }
 0x346   :  { %v2880_v48 = vpop.eup %2879  ;;  %1033 = vrot.lane.b32.xlu1 %v2878_v56, %s2891_s10 }
 0x347   :  { %1031 = vrot.lane.b32.xlu0 %v2880_v48, %s2891_s10  ;;  %v127_v48 = vld [vmem:[%s3725_s1 + $0x40] sm:$0xff] }
 0x349   :  { %v2882_v50 = vpop.eup %2881 }
 0x34a   :  { %v2884_v39 = vpop.eup %2883  ;;  %1037 = vrot.lane.b32.xlu1 %v2882_v50, %s2891_s10  ;;  %v128_v50 = vld [vmem:[%s3725_s1 + $0x48] sm:$0xff] }
 0x34b   :  { %1035 = vrot.lane.b32.xlu0 %v2884_v39, %s2891_s10  ;;  %v129_v39 = vld [vmem:[%s3725_s1 + $0x50] sm:$0xff] }
 0x34d   :  { %v2886_v51 = vpop.eup %2885 }
 0x34e   :  { %v2888_v52 = vpop.eup %2887  ;;  %1041 = vrot.lane.b32.xlu1 %v2886_v51, %s2891_s10  ;;  %v2756_v51 = vpack.c.bf16 %v128_v50, %v127_v48  ;;  %v1816_v50 = vld [vmem:[%s3729_s4 + $0x20] sm:$0xff] }
 0x34f   :  { %1039 = vrot.lane.b32.xlu0 %v2888_v52, %s2891_s10  ;;  %v130_v52 = vld [vmem:[%s3725_s1 + $0x58] sm:$0xff] }
 0x350   :  { %2757 = vmatprep.subr.bf16.mxu1 %v2756_v51 }
 0x351   :  { %2759 = vmatpush3.bf16.msra.mxu1 %v2756_v51 }
 0x352   :  { %1161 = vrot.lane.b32.xlu1 %v2951_v3, %s2890_s3 }
 0x353   :  { %1159 = vrot.lane.b32.xlu0 %v2937_v1, %s2890_s3 }
 0x356   :  { %1165 = vrot.lane.b32.xlu1 %v2965_v5, %s2890_s3 }
 0x357   :  { %1163 = vrot.lane.b32.xlu0 %v2960_v4, %s2890_s3 }
 0x35a   :  { %1169 = vrot.lane.b32.xlu1 %v2997_v15, %s2890_s3 }
 0x35b   :  { %1167 = vrot.lane.b32.xlu0 %v2992_v14, %s2890_s3 }
 0x35e   :  { %1173 = vrot.lane.b32.xlu1 %v3017_v20, %s2890_s3 }
 0x35f   :  { %1171 = vrot.lane.b32.xlu0 %v3012_v19, %s2890_s3 }
 0x362   :  { %1177 = vrot.lane.b32.xlu1 %v3031_v23, %s2890_s3 }
 0x363   :  { %1175 = vrot.lane.b32.xlu0 %v3026_v22, %s2890_s3 }
 0x366   :  { %1181 = vrot.lane.b32.xlu1 %v3045_v25, %s2890_s3 }
 0x367   :  { %1179 = vrot.lane.b32.xlu0 %v3040_v24, %s2890_s3 }
 0x36a   :  { %1185 = vrot.lane.b32.xlu1 %v3059_v27, %s2890_s3 }
 0x36b   :  { %1183 = vrot.lane.b32.xlu0 %v3054_v26, %s2890_s3 }
 0x3a4   :  { %v1014_v55 = vpop.permute.xlu1 %1013 }
 0x3a5   :  { %v1060_v57 = vmul.f32 %v1014_v55, %v2946_v2  ;;  %v1012_v59 = vpop.permute.xlu0 %1011  ;;  %v2760_v55 = vpack.c.bf16 %v130_v52, %v129_v39  ;;  %v1817_v39 = vld [vmem:[%s3729_s4 + $0x28] sm:$0xff] }
 0x3a6   :  { %v1059_v62 = vmul.f32 %v1012_v59, %v2932_v0  ;;  %v131_v59 = vld [vmem:[%s3725_s1 + $0x60] sm:$0xff] }
 0x3a7   :  { %1093 = vrot.lane.b32.xlu1 %v1060_v57, %s2892_s2  ;;  %2761 = vmatprep.subr.bf16.mxu1 %v2760_v55 }
 0x3a8   :  { %v1018_v63 = vpop.permute.xlu1 %1017  ;;  %1091 = vrot.lane.b32.xlu0 %v1059_v62, %s2892_s2  ;;  %v132_v62 = vld [vmem:[%s3725_s1 + $0x68] sm:$0xff]  ;;  %2763 = vmatpush3.bf16.msra.mxu1 %v2760_v55 }
 0x3a9   :  { %v1062_v6 = vmul.f32 %v1018_v63, %v2951_v3  ;;  %v1016_v7 = vpop.permute.xlu0 %1015  ;;  %v2764_v63 = vpack.c.bf16 %v132_v62, %v131_v59  ;;  %v2780_v59 = vpack.c.bf16 %v1817_v39, %v1816_v50 }
 0x3aa   :  { %v1061_v8 = vmul.f32 %v1016_v7, %v2937_v1  ;;  %v134_v7 = vld [vmem:[%s3725_s1 + $0x78] sm:$0xff] }
 0x3ab   :  { %1097 = vrot.lane.b32.xlu1 %v1062_v6, %s2892_s2  ;;  %v133_v6 = vld [vmem:[%s3725_s1 + $0x70] sm:$0xff]  ;;  %2765 = vmatprep.subr.bf16.mxu1 %v2764_v63 }
 0x3ac   :  { %v1022_v11 = vpop.permute.xlu1 %1021  ;;  %1095 = vrot.lane.b32.xlu0 %v1061_v8, %s2892_s2  ;;  %2767 = vmatpush3.bf16.msra.mxu1 %v2764_v63  ;;  %v1818_v63 = vld [vmem:[%s3729_s4 + $0x30] sm:$0xff] }
 0x3ad   :  { %v1064_v2 = vmul.f32 %v1022_v11, %v2965_v5  ;;  %v1020_v13 = vpop.permute.xlu0 %1019 }
 0x3ae   :  { %v1063_v0 = vmul.f32 %v1020_v13, %v2960_v4 }
 0x3af   :  { %1101 = vrot.lane.b32.xlu1 %v1064_v2, %s2892_s2  ;;  %v2768_v2 = vpack.c.bf16 %v134_v7, %v133_v6  ;;  %v1819_v6 = vld [vmem:[%s3729_s4 + $0x38] sm:$0xff] }
 0x3b0   :  { %v1026_v16 = vpop.permute.xlu1 %1025  ;;  %1099 = vrot.lane.b32.xlu0 %v1063_v0, %s2892_s2 }
 0x3b1   :  { %v1066_v3 = vmul.f32 %v1026_v16, %v2997_v15  ;;  %v1024_v18 = vpop.permute.xlu0 %1023  ;;  %2769 = vmatprep.subr.bf16.mxu1 %v2768_v2 }
 0x3b2   :  { %v1065_v1 = vmul.f32 %v1024_v18, %v2992_v14  ;;  %2771 = vmatpush3.bf16.msra.mxu1 %v2768_v2 }
 0x3b3   :  { %1105 = vrot.lane.b32.xlu1 %v1066_v3, %s2892_s2 }
 0x3b4   :  { %v1030_v28 = vpop.permute.xlu1 %1029  ;;  %1103 = vrot.lane.b32.xlu0 %v1065_v1, %s2892_s2 }
 0x3b5   :  { %v1068_v5 = vmul.f32 %v1030_v28, %v3017_v20  ;;  %v1028_v29 = vpop.permute.xlu0 %1027 }
 0x3b6   :  { %v1067_v4 = vmul.f32 %v1028_v29, %v3012_v19 }
 0x3b7   :  { %1109 = vrot.lane.b32.xlu1 %v1068_v5, %s2892_s2 }
 0x3b8   :  { %v1034_v31 = vpop.permute.xlu1 %1033  ;;  %1107 = vrot.lane.b32.xlu0 %v1067_v4, %s2892_s2 }
 0x3b9   :  { %v1070_v15 = vmul.f32 %v1034_v31, %v3031_v23  ;;  %v1032_v32 = vpop.permute.xlu0 %1031 }
 0x3ba   :  { %v1069_v14 = vmul.f32 %v1032_v32, %v3026_v22 }
 0x3bb   :  { %1113 = vrot.lane.b32.xlu1 %v1070_v15, %s2892_s2 }
 0x3bc   :  { %v1038_v34 = vpop.permute.xlu1 %1037  ;;  %1111 = vrot.lane.b32.xlu0 %v1069_v14, %s2892_s2 }
 0x3bd   :  { %v1072_v20 = vmul.f32 %v1038_v34, %v3045_v25  ;;  %v1036_v36 = vpop.permute.xlu0 %1035 }
 0x3be   :  { %v1071_v19 = vmul.f32 %v1036_v36, %v3040_v24 }
 0x3bf   :  { %1117 = vrot.lane.b32.xlu1 %v1072_v20, %s2892_s2 }
 0x3c0   :  { %v1042_v37 = vpop.permute.xlu1 %1041  ;;  %1115 = vrot.lane.b32.xlu0 %v1071_v19, %s2892_s2 }
 0x3c1   :  { %v1074_v23 = vmul.f32 %v1042_v37, %v3059_v27  ;;  %v1040_v41 = vpop.permute.xlu0 %1039 }
 0x3c2   :  { %v1073_v22 = vmul.f32 %v1040_v41, %v3054_v26 }
 0x3c3   :  { %1121 = vrot.lane.b32.xlu1 %v1074_v23, %s2892_s2 }
 0x3c4   :  { %1119 = vrot.lane.b32.xlu0 %v1073_v22, %s2892_s2  ;;  %v1162_v42 = vpop.permute.xlu1 %1161 }
 0x3c5   :  { %v1160_v43 = vpop.permute.xlu0 %1159 }
 0x3c6   :  { %2541 = vmatprep.mubr.msk.f32.mxu0 %vm1187_vm3, %v1160_v43 }
 0x3c7   :  { %1997 = vrot.lane.b32.xlu1 %v3289_v58, %s2893_s13  ;;  %2542 = vmatmul.mubr.msk.f32.gmra.mrb[22].mxu0 %vm1187_vm3, %v1162_v42 }
 0x3c8   :  { %1995 = vrot.lane.b32.xlu0 %v3292_v61, %s2893_s13  ;;  %v1166_v24 = vpop.permute.xlu1 %1165 }
 0x3c9   :  { %v1164_v25 = vpop.permute.xlu0 %1163 }
 0x3ca   :  { %2544 = vmatprep.mubr.msk.f32.mxu0 %vm1187_vm3, %v1164_v25  ;;  %v1815_v25 = vld [vmem:[%s3729_s4 + $0x18] sm:$0xff] }
 0x3cb   :  { %2001 = vrot.lane.b32.xlu1 %v3299_v9, %s2893_s13  ;;  %2545 = vmatmul.mubr.msk.f32.gmra.mrb[24].mxu0 %vm1187_vm3, %v1166_v24  ;;  %v1814_v24 = vld [vmem:[%s3729_s4 + $0x10] sm:$0xff] }
 0x3cc   :  { %1999 = vrot.lane.b32.xlu0 %v3302_v12, %s2893_s13  ;;  %v1170_v26 = vpop.permute.xlu1 %1169 }
 0x3cd   :  { %v1168_v27 = vpop.permute.xlu0 %1167 }
 0x3ce   :  { %2547 = vmatprep.mubr.msk.f32.mxu0 %vm1187_vm3, %v1168_v27 }
 0x3cf   :  { %2005 = vrot.lane.b32.xlu1 %v3307_v21, %s2893_s13  ;;  %2548 = vmatmul.mubr.msk.f32.gmra.mrb[26].mxu0 %vm1187_vm3, %v1170_v26 }
 0x3d0   :  { %2003 = vrot.lane.b32.xlu0 %v3310_v30, %s2893_s13  ;;  %v1174_v44 = vpop.permute.xlu1 %1173 }
 0x3d1   :  { %v1172_v46 = vpop.permute.xlu0 %1171 }
 0x3d2   :  { %2550 = vmatprep.mubr.msk.f32.mxu0 %vm1187_vm3, %v1172_v46 }
 0x3d3   :  { %2009 = vrot.lane.b32.xlu1 %v3315_v35, %s2893_s13  ;;  %2551 = vmatmul.mubr.msk.f32.gmra.mrb[28].mxu0 %vm1187_vm3, %v1174_v44 }
 0x3d4   :  { %2007 = vrot.lane.b32.xlu0 %v3318_v38, %s2893_s13  ;;  %v1178_v47 = vpop.permute.xlu1 %1177 }
 0x3d5   :  { %v1176_v56 = vpop.permute.xlu0 %1175 }
 0x3d6   :  { %2553 = vmatprep.mubr.msk.f32.mxu0 %vm1187_vm3, %v1176_v56  ;;  %v2776_v56 = vpack.c.bf16 %v1815_v25, %v1814_v24  ;;  %v1827_v24 = vld [vmem:[%s3729_s4 + $0x78] sm:$0xff]  ;;  %v2163_v25 = vld [vmem:[%s3728_s5 + $0x4] ss:$0 sm:$0xff] }
 0x3d7   :  { %2013 = vrot.lane.b32.xlu1 %v3323_v45, %s2893_s13  ;;  %2554 = vmatmul.mubr.msk.f32.gmra.mrb[30].mxu0 %vm1187_vm3, %v1178_v47 }
 0x3d8   :  { %2011 = vrot.lane.b32.xlu0 %v3326_v49, %s2893_s13  ;;  %v1182_v53 = vpop.permute.xlu1 %1181 }
 0x3d9   :  { %v1180_v57 = vpop.permute.xlu0 %1179 }
 0x3da   :  { %2556 = vmatprep.mubr.msk.f32.mxu0 %vm1187_vm3, %v1180_v57 }
 0x3db   :  { %2017 = vrot.lane.b32.xlu1 %v3333_v54, %s2893_s13  ;;  %2557 = vmatmul.mubr.msk.f32.gmra.mrb[32].mxu0 %vm1187_vm3, %v1182_v53 }
 0x3dc   :  { %2015 = vrot.lane.b32.xlu0 %v3336_v60, %s2893_s13  ;;  %v1186_v11 = vpop.permute.xlu1 %1185 }
 0x3dd   :  { %v1184_v8 = vpop.permute.xlu0 %1183 }
 0x3de   :  { %2559 = vmatprep.mubr.msk.f32.mxu0 %vm1187_vm3, %v1184_v8 }
 0x3df   :  { %2021 = vrot.lane.b32.xlu1 %v3343_v10, %s2893_s13  ;;  %2560 = vmatmul.mubr.msk.f32.gmra.mrb[34].mxu0 %vm1187_vm3, %v1186_v11 }
 0x3e0   :  { %2019 = vrot.lane.b32.xlu0 %v3346_v17, %s2893_s13 }
 0x3e3   :  { %2025 = vrot.lane.b32.xlu1 %v3353_v33, %s2893_s13 }
 0x3e4   :  { %2023 = vrot.lane.b32.xlu0 %v3356_v40, %s2893_s13 }
 0x419   :  { %v1094_v13 = vpop.permute.xlu1 %1093 }
 0x41a   :  { %v1092_v0 = vpop.permute.xlu0 %1091  ;;  %v1140_v3 = vadd.f32 %v1094_v13, %v3289_v58 }
 0x41b   :  { %v1139_v16 = vadd.f32 %v1092_v0, %v3292_v61  ;;  %v2784_v0 = vpack.c.bf16 %v1819_v6, %v1818_v63 }
 0x41d   :  { %v1098_v18 = vpop.permute.xlu1 %1097  ;;  %2564 = vmatprep.mubr.msk.f32.mxu0 %vm1365_vm4, %v1139_v16 }
 0x41e   :  { %2565 = vmatmul.mubr.msk.f32.vlgmr.msra.gmra.mrb[20].mxu0 %vm1365_vm4, %v1140_v3  ;;  %v1096_v1 = vpop.permute.xlu0 %1095  ;;  %v1142_v5 = vadd.f32 %v1098_v18, %v3299_v9  ;;  %v1820_v3 = vld [vmem:[%s3729_s4 + $0x40] sm:$0xff]  ;;  %v1821_v18 = vld [vmem:[%s3729_s4 + $0x48] sm:$0xff] }
 0x41f   :  { %v1141_v28 = vadd.f32 %v1096_v1, %v3302_v12 }
 0x421   :  { %v1102_v29 = vpop.permute.xlu1 %1101  ;;  %2567 = vmatprep.mubr.msk.f32.mxu0 %vm1365_vm4, %v1141_v28 }
 0x422   :  { %2568 = vmatmul.mubr.msk.f32.gmra.mrb[22].mxu0 %vm1365_vm4, %v1142_v5  ;;  %v1100_v4 = vpop.permute.xlu0 %1099  ;;  %v1144_v58 = vadd.f32 %v1102_v29, %v3307_v21 }
 0x423   :  { %v1143_v61 = vadd.f32 %v1100_v4, %v3310_v30 }
 0x425   :  { %v1106_v31 = vpop.permute.xlu1 %1105  ;;  %2570 = vmatprep.mubr.msk.f32.mxu0 %vm1365_vm4, %v1143_v61  ;;  %v2788_v61 = vpack.c.bf16 %v1821_v18, %v1820_v3 }
 0x426   :  { %2571 = vmatmul.mubr.msk.f32.gmra.mrb[24].mxu0 %vm1365_vm4, %v1144_v58  ;;  %v1104_v15 = vpop.permute.xlu0 %1103  ;;  %v1146_v9 = vadd.f32 %v1106_v31, %v3315_v35  ;;  %v1822_v31 = vld [vmem:[%s3729_s4 + $0x50] sm:$0xff] }
 0x427   :  { %v1145_v12 = vadd.f32 %v1104_v15, %v3318_v38  ;;  %v1823_v15 = vld [vmem:[%s3729_s4 + $0x58] sm:$0xff] }
 0x429   :  { %v1110_v32 = vpop.permute.xlu1 %1109  ;;  %2573 = vmatprep.mubr.msk.f32.mxu0 %vm1365_vm4, %v1145_v12 }
 0x42a   :  { %2574 = vmatmul.mubr.msk.f32.gmra.mrb[26].mxu0 %vm1365_vm4, %v1146_v9  ;;  %v1108_v14 = vpop.permute.xlu0 %1107  ;;  %v1148_v21 = vadd.f32 %v1110_v32, %v3323_v45 }
 0x42b   :  { %v1147_v30 = vadd.f32 %v1108_v14, %v3326_v49 }
 0x42d   :  { %v1114_v34 = vpop.permute.xlu1 %1113  ;;  %2576 = vmatprep.mubr.msk.f32.mxu0 %vm1365_vm4, %v1147_v30 }
 0x42e   :  { %2577 = vmatmul.mubr.msk.f32.gmra.mrb[28].mxu0 %vm1365_vm4, %v1148_v21  ;;  %v1112_v20 = vpop.permute.xlu0 %1111  ;;  %v1150_v35 = vadd.f32 %v1114_v34, %v3333_v54  ;;  %v2792_v21 = vpack.c.bf16 %v1823_v15, %v1822_v31 }
 0x42f   :  { %v1149_v38 = vadd.f32 %v1112_v20, %v3336_v60  ;;  %v1824_v20 = vld [vmem:[%s3729_s4 + $0x60] sm:$0xff] }
 0x431   :  { %v1118_v36 = vpop.permute.xlu1 %1117  ;;  %2579 = vmatprep.mubr.msk.f32.mxu0 %vm1365_vm4, %v1149_v38  ;;  %v1825_v38 = vld [vmem:[%s3729_s4 + $0x68] sm:$0xff] }
 0x432   :  { %2580 = vmatmul.mubr.msk.f32.gmra.mrb[30].mxu0 %vm1365_vm4, %v1150_v35  ;;  %v1116_v19 = vpop.permute.xlu0 %1115  ;;  %v1152_v45 = vadd.f32 %v1118_v36, %v3343_v10  ;;  %v1813_v10 = vld [vmem:[%s3729_s4 + $0x8] sm:$0xff] }
 0x433   :  { %v1151_v49 = vadd.f32 %v1116_v19, %v3346_v17  ;;  %v1812_v17 = vld [vmem:[%s3729_s4] sm:$0xff] }
 0x434   :  { %v2772_v41 = vpack.c.bf16 %v1813_v10, %v1812_v17 }
 0x435   :  { %v1122_v37 = vpop.permute.xlu1 %1121  ;;  %2582 = vmatprep.mubr.msk.f32.mxu0 %vm1365_vm4, %v1151_v49 }
 0x436   :  { %2583 = vmatmul.mubr.msk.f32.gmra.mrb[32].mxu0 %vm1365_vm4, %v1152_v45  ;;  %v1120_v23 = vpop.permute.xlu0 %1119  ;;  %v1154_v54 = vadd.f32 %v1122_v37, %v3353_v33  ;;  %2773 = vmatprep.subr.bf16.mxu1 %v2772_v41  ;;  %v2796_v37 = vpack.c.bf16 %v1825_v38, %v1824_v20 }
 0x437   :  { %v1153_v60 = vadd.f32 %v1120_v23, %v3356_v40  ;;  %v3544_v40 = vld [vmem:[%s3728_s5 + $0x3] ss:$0 sm:$0xff] }
 0x439   :  { %2585 = vmatprep.mubr.msk.f32.mxu0 %vm1365_vm4, %v1153_v60 }
 0x43a   :  { %2586 = vmatmul.mubr.msk.f32.gmra.mrb[34].mxu0 %vm1365_vm4, %v1154_v54 }
 0x4f1   :  { %v2566_v33 = vpop.f32.mrb[20].mxu0 }
 0x4f2   :  { %v1566_v22 = vadd.f32 %v2566_v33, %v3544_v40  ;;  %v1480_v42 = vpop.f32.mrb[21].mxu0 }
 0x4f3   :  { %v1565_v43 = vadd.f32 %v3544_v40, %v1480_v42 }
 0x4f4   :  { %v1582_v44 = vmax.f32 %v1566_v22, 0.0 }
 0x4f5   :  { %v1581_v26 = vmax.f32 %v1565_v43, 0.0  ;;  %v2569_v27 = vpop.f32.mrb[22].mxu0  ;;  %v1826_v43 = vld [vmem:[%s3729_s4 + $0x70] sm:$0xff] }
 0x4f6   :  { %v1568_v46 = vadd.f32 %v2569_v27, %v3544_v40  ;;  %v1490_v47 = vpop.f32.mrb[23].mxu0 }
 0x4f7   :  { %v1567_v48 = vadd.f32 %v3544_v40, %v1490_v47  ;;  %2604 = vmatprep.mubr.msk.f32.mxu1 %vm753_vm2, %v1581_v26 }
 0x4f8   :  { %2605 = vmatmul.mubr.msk.f32.vlgmr.msra.gmra.mrb[28].mxu1 %vm753_vm2, %v1582_v44  ;;  %v1584_v53 = vmax.f32 %v1568_v46, 0.0 }
 0x4f9   :  { %v1583_v51 = vmax.f32 %v1567_v48, 0.0  ;;  %v2572_v52 = vpop.f32.mrb[24].mxu0  ;;  %2775 = vmatpush3.bf16.msra.mxu1 %v2772_v41 }
 0x4fa   :  { %v1570_v55 = vadd.f32 %v2572_v52, %v3544_v40  ;;  %v1500_v57 = vpop.f32.mrb[25].mxu0  ;;  %2777 = vmatprep.subr.bf16.mxu1 %v2776_v56 }
 0x4fb   :  { %v1569_v62 = vadd.f32 %v3544_v40, %v1500_v57  ;;  %2607 = vmatprep.mubr.msk.f32.mxu1 %vm753_vm2, %v1583_v51 }
 0x4fc   :  { %2608 = vmatmul.mubr.msk.f32.gmra.mrb[30].mxu1 %vm753_vm2, %v1584_v53  ;;  %v1586_v11 = vmax.f32 %v1570_v55, 0.0 }
 0x4fd   :  { %v1585_v7 = vmax.f32 %v1569_v62, 0.0  ;;  %v2575_v8 = vpop.f32.mrb[26].mxu0  ;;  %2779 = vmatpush3.bf16.msra.mxu1 %v2776_v56 }
 0x4fe   :  { %v1572_v2 = vadd.f32 %v2575_v8, %v3544_v40  ;;  %v1510_v13 = vpop.f32.mrb[27].mxu0  ;;  %2781 = vmatprep.subr.bf16.mxu1 %v2780_v59 }
 0x4ff   :  { %v1571_v16 = vadd.f32 %v3544_v40, %v1510_v13  ;;  %2610 = vmatprep.mubr.msk.f32.mxu1 %vm753_vm2, %v1585_v7 }
 0x500   :  { %2611 = vmatmul.mubr.msk.f32.gmra.mrb[32].mxu1 %vm753_vm2, %v1586_v11  ;;  %v1588_v5 = vmax.f32 %v1572_v2, 0.0 }
 0x501   :  { %v1587_v1 = vmax.f32 %v1571_v16, 0.0  ;;  %v2578_v28 = vpop.f32.mrb[28].mxu0  ;;  %2783 = vmatpush3.bf16.msra.mxu1 %v2780_v59 }
 0x502   :  { %v1574_v29 = vadd.f32 %v2578_v28, %v3544_v40  ;;  %v1520_v4 = vpop.f32.mrb[29].mxu0  ;;  %2785 = vmatprep.subr.bf16.mxu1 %v2784_v0 }
 0x503   :  { %v1573_v58 = vadd.f32 %v3544_v40, %v1520_v4  ;;  %2613 = vmatprep.mubr.msk.f32.mxu1 %vm753_vm2, %v1587_v1 }
 0x504   :  { %2614 = vmatmul.mubr.msk.f32.gmra.mrb[34].mxu1 %vm753_vm2, %v1588_v5  ;;  %v1590_v32 = vmax.f32 %v1574_v29, 0.0 }
 0x505   :  { %v1589_v12 = vmax.f32 %v1573_v58, 0.0  ;;  %v2581_v9 = vpop.f32.mrb[30].mxu0  ;;  %2787 = vmatpush3.bf16.msra.mxu1 %v2784_v0 }
 0x506   :  { %v1576_v14 = vadd.f32 %v2581_v9, %v3544_v40  ;;  %v1530_v30 = vpop.f32.mrb[31].mxu0  ;;  %2789 = vmatprep.subr.bf16.mxu1 %v2788_v61 }
 0x507   :  { %v1575_v34 = vadd.f32 %v3544_v40, %v1530_v30  ;;  %2616 = vmatprep.mubr.msk.f32.mxu1 %vm753_vm2, %v1589_v12 }
 0x508   :  { %2617 = vmatmul.mubr.msk.f32.gmra.mrb[36].mxu1 %vm753_vm2, %v1590_v32  ;;  %v1592_v19 = vmax.f32 %v1576_v14, 0.0 }
 0x509   :  { %v1591_v35 = vmax.f32 %v1575_v34, 0.0  ;;  %v2584_v36 = vpop.f32.mrb[32].mxu0  ;;  %2791 = vmatpush3.bf16.msra.mxu1 %v2788_v61 }
 0x50a   :  { %v1578_v49 = vadd.f32 %v2584_v36, %v3544_v40  ;;  %v1540_v45 = vpop.f32.mrb[33].mxu0  ;;  %2793 = vmatprep.subr.bf16.mxu1 %v2792_v21 }
 0x50b   :  { %v1577_v23 = vadd.f32 %v3544_v40, %v1540_v45  ;;  %2619 = vmatprep.mubr.msk.f32.mxu1 %vm753_vm2, %v1591_v35  ;;  %v1996_v45 = vpop.permute.xlu0 %1995 }
 0x50c   :  { %2620 = vmatmul.mubr.msk.f32.gmra.mrb[38].mxu1 %vm753_vm2, %v1592_v19  ;;  %v1594_v17 = vmax.f32 %v1578_v49, 0.0  ;;  %v1998_v49 = vpop.permute.xlu1 %1997 }
 0x50d   :  { %v1593_v60 = vmax.f32 %v1577_v23, 0.0  ;;  %v2587_v54 = vpop.f32.mrb[34].mxu0  ;;  %2795 = vmatpush3.bf16.msra.mxu1 %v2792_v21 }
 0x50e   :  { %v1580_v10 = vadd.f32 %v2587_v54, %v3544_v40  ;;  %v1550_v41 = vpop.f32.mrb[35].mxu0  ;;  %2797 = vmatprep.subr.bf16.mxu1 %v2796_v37 }
 0x50f   :  { %v1579_v33 = vadd.f32 %v3544_v40, %v1550_v41  ;;  %2622 = vmatprep.mubr.msk.f32.mxu1 %vm753_vm2, %v1593_v60  ;;  %v2800_v40 = vpack.c.bf16 %v1827_v24, %v1826_v43  ;;  %v2000_v23 = vpop.permute.xlu0 %1999  ;;  %v3626_v60 = vld [vmem:[%s3728_s5 + $0x5] ss:$0 sm:$0xff] }
 0x510   :  { %2623 = vmatmul.mubr.msk.f32.gmra.mrb[40].mxu1 %vm753_vm2, %v1594_v17  ;;  %v1596_v42 = vmax.f32 %v1580_v10, 0.0 }
 0x511   :  { %v1595_v22 = vmax.f32 %v1579_v33, 0.0  ;;  %2799 = vmatpush3.bf16.msra.mxu1 %v2796_v37  ;;  %v2002_v37 = vpop.permute.xlu1 %2001 }
 0x512   :  { %2801 = vmatprep.subr.bf16.mxu1 %v2800_v40 }
 0x513   :  { %2625 = vmatprep.mubr.msk.f32.mxu1 %vm753_vm2, %v1595_v22  ;;  %v2004_v10 = vpop.permute.xlu0 %2003 }
 0x514   :  { %2626 = vmatmul.mubr.msk.f32.gmra.mrb[42].mxu1 %vm753_vm2, %v1596_v42 }
 0x515   :  { %2803 = vmatpush3.bf16.msra.mxu1 %v2800_v40  ;;  %v2006_v54 = vpop.permute.xlu1 %2005 }
 0x5cb   :  { %v2606_v26 = vpop.f32.mrb[28].mxu1 }
 0x5cc   :  { %v1723_v27 = vadd.f32 %v2606_v26, %v2163_v25  ;;  %v1717_v44 = vpop.f32.mrb[29].mxu1  ;;  %v2010_v26 = vpop.permute.xlu1 %2009 }
 0x5cd   :  { %v1718_v46 = vadd.f32 %v2163_v25, %v1717_v44  ;;  %v2008_v44 = vpop.permute.xlu0 %2007 }
 0x5ce   :  { %v1797_v48 = vmax.f32 %v1723_v27, 0.0 }
 0x5cf   :  { %v1796_v47 = vmax.f32 %v1718_v46, 0.0  ;;  %v2609_v56 = vpop.f32.mrb[30].mxu1 }
 0x5d0   :  { %v1733_v50 = vadd.f32 %v2609_v56, %v2163_v25  ;;  %v1727_v39 = vpop.f32.mrb[31].mxu1 }
 0x5d1   :  { %v1728_v51 = vadd.f32 %v2163_v25, %v1727_v39  ;;  %2660 = vmatprep.mubr.f32.mxu1 %v1796_v47 }
 0x5d2   :  { %2661 = vmatmul.mubr.f32.vlgmr.msra.gmra.mrb[44].mxu1 %v1797_v48  ;;  %v1799_v55 = vmax.f32 %v1733_v50, 0.0 }
 0x5d3   :  { %v1798_v52 = vmax.f32 %v1728_v51, 0.0  ;;  %v2612_v53 = vpop.f32.mrb[32].mxu1 }
 0x5d4   :  { %v1743_v57 = vadd.f32 %v2612_v53, %v2163_v25  ;;  %v1737_v59 = vpop.f32.mrb[33].mxu1 }
 0x5d5   :  { %v1738_v62 = vadd.f32 %v2163_v25, %v1737_v59  ;;  %2663 = vmatprep.mubr.f32.mxu1 %v1798_v52  ;;  %v2014_v52 = vpop.permute.xlu1 %2013 }
 0x5d6   :  { %2664 = vmatmul.mubr.f32.gmra.mrb[46].mxu1 %v1799_v55  ;;  %v1801_v7 = vmax.f32 %v1743_v57, 0.0  ;;  %v2012_v57 = vpop.permute.xlu0 %2011 }
 0x5d7   :  { %v1800_v63 = vmax.f32 %v1738_v62, 0.0  ;;  %v2615_v6 = vpop.f32.mrb[34].mxu1 }
 0x5d8   :  { %v1753_v8 = vadd.f32 %v2615_v6, %v2163_v25  ;;  %v1747_v11 = vpop.f32.mrb[35].mxu1 }
 0x5d9   :  { %v1748_v2 = vadd.f32 %v2163_v25, %v1747_v11  ;;  %2666 = vmatprep.mubr.f32.mxu1 %v1800_v63 }
 0x5da   :  { %2667 = vmatmul.mubr.f32.gmra.mrb[48].mxu1 %v1801_v7  ;;  %v1803_v16 = vmax.f32 %v1753_v8, 0.0 }
 0x5db   :  { %v1802_v13 = vmax.f32 %v1748_v2, 0.0  ;;  %v2618_v0 = vpop.f32.mrb[36].mxu1 }
 0x5dc   :  { %v1763_v3 = vadd.f32 %v2618_v0, %v2163_v25  ;;  %v1757_v18 = vpop.f32.mrb[37].mxu1 }
 0x5dd   :  { %v1758_v1 = vadd.f32 %v2163_v25, %v1757_v18  ;;  %2669 = vmatprep.mubr.f32.mxu1 %v1802_v13  ;;  %v2018_v13 = vpop.permute.xlu1 %2017 }
 0x5de   :  { %2670 = vmatmul.mubr.f32.gmra.mrb[50].mxu1 %v1803_v16  ;;  %v1805_v29 = vmax.f32 %v1763_v3, 0.0  ;;  %v2016_v16 = vpop.permute.xlu0 %2015 }
 0x5df   :  { %v1804_v28 = vmax.f32 %v1758_v1, 0.0  ;;  %v2621_v5 = vpop.f32.mrb[38].mxu1 }
 0x5e0   :  { %v1773_v4 = vadd.f32 %v2621_v5, %v2163_v25  ;;  %v1767_v61 = vpop.f32.mrb[39].mxu1 }
 0x5e1   :  { %v1768_v58 = vadd.f32 %v2163_v25, %v1767_v61  ;;  %2672 = vmatprep.mubr.f32.mxu1 %v1804_v28  ;;  %v2022_v61 = vpop.permute.xlu1 %2021 }
 0x5e2   :  { %2673 = vmatmul.mubr.f32.gmra.mrb[52].mxu1 %v1805_v29  ;;  %v1807_v12 = vmax.f32 %v1773_v4, 0.0 }
 0x5e3   :  { %v1806_v31 = vmax.f32 %v1768_v58, 0.0  ;;  %v2624_v15 = vpop.f32.mrb[40].mxu1 }
 0x5e4   :  { %v1783_v9 = vadd.f32 %v2624_v15, %v2163_v25  ;;  %v1777_v32 = vpop.f32.mrb[41].mxu1  ;;  %v2020_v15 = vpop.permute.xlu0 %2019 }
 0x5e5   :  { %v1778_v14 = vadd.f32 %v2163_v25, %v1777_v32  ;;  %2675 = vmatprep.mubr.f32.mxu1 %v1806_v31 }
 0x5e6   :  { %2676 = vmatmul.mubr.f32.gmra.mrb[54].mxu1 %v1807_v12  ;;  %v1809_v34 = vmax.f32 %v1783_v9, 0.0 }
 0x5e7   :  { %v1808_v30 = vmax.f32 %v1778_v14, 0.0  ;;  %v2627_v21 = vpop.f32.mrb[42].mxu1 }
 0x5e8   :  { %v1793_v20 = vadd.f32 %v2627_v21, %v2163_v25  ;;  %v1787_v38 = vpop.f32.mrb[43].mxu1 }
 0x5e9   :  { %v1788_v35 = vadd.f32 %v2163_v25, %v1787_v38  ;;  %2678 = vmatprep.mubr.f32.mxu1 %v1808_v30  ;;  %v2026_v38 = vpop.permute.xlu1 %2025 }
 0x5ea   :  { %2679 = vmatmul.mubr.f32.gmra.mrb[56].mxu1 %v1809_v34  ;;  %v1811_v19 = vmax.f32 %v1793_v20, 0.0 }
 0x5eb   :  { %v1810_v36 = vmax.f32 %v1788_v35, 0.0 }
 0x5ed   :  { %2681 = vmatprep.mubr.f32.mxu1 %v1810_v36  ;;  %v2024_v36 = vpop.permute.xlu0 %2023 }
 0x5ee   :  { %2682 = vmatmul.mubr.f32.gmra.mrb[58].mxu1 %v1811_v19 }
 0x6a5   :  { %v2662_v17 = vpop.f32.mrb[44].mxu1 }
 0x6a6   :  { %v1906_v41 = vadd.f32 %v2662_v17, %v3626_v60  ;;  %v1900_v33 = vpop.f32.mrb[45].mxu1 }
 0x6a7   :  { %v1901_v22 = vadd.f32 %v3626_v60, %v1900_v33 }
 0x6a8   :  { %v2044_v42 = vsel %vm340_vm1, %v1906_v41, %v1998_v49 }
 0x6a9   :  { %2060 = vst.msk [vmem:[%s3730_s6 + $0x8] sm:$0xff] %vm1187_vm3, %v2044_v42  ;;  %v2043_v43 = vsel %vm340_vm1, %v1901_v22, %v1996_v45  ;;  %v2665_v24 = vpop.f32.mrb[46].mxu1 }
 0x6aa   :  { %2059 = vst.msk [vmem:[%s3730_s6] sm:$0xff] %vm1187_vm3, %v2043_v43  ;;  %v1916_v40 = vadd.f32 %v2665_v24, %v3626_v60  ;;  %v1910_v25 = vpop.f32.mrb[47].mxu1 }
 0x6ab   :  { %v1911_v27 = vadd.f32 %v3626_v60, %v1910_v25 }
 0x6ac   :  { %v2046_v46 = vsel %vm340_vm1, %v1916_v40, %v2002_v37 }
 0x6ad   :  { %2062 = vst.msk [vmem:[%s3730_s6 + $0x18] sm:$0xff] %vm1187_vm3, %v2046_v46  ;;  %v2045_v47 = vsel %vm340_vm1, %v1911_v27, %v2000_v23  ;;  %v2668_v56 = vpop.f32.mrb[48].mxu1 }
 0x6ae   :  { %2061 = vst.msk [vmem:[%s3730_s6 + $0x10] sm:$0xff] %vm1187_vm3, %v2045_v47  ;;  %v1926_v48 = vadd.f32 %v2668_v56, %v3626_v60  ;;  %v1920_v50 = vpop.f32.mrb[49].mxu1 }
 0x6af   :  { %v1921_v39 = vadd.f32 %v3626_v60, %v1920_v50 }
 0x6b0   :  { %v2048_v51 = vsel %vm340_vm1, %v1926_v48, %v2006_v54 }
 0x6b1   :  { %2064 = vst.msk [vmem:[%s3730_s6 + $0x28] sm:$0xff] %vm1187_vm3, %v2048_v51  ;;  %v2047_v53 = vsel %vm340_vm1, %v1921_v39, %v2004_v10  ;;  %v2671_v55 = vpop.f32.mrb[50].mxu1 }
 0x6b2   :  { %2063 = vst.msk [vmem:[%s3730_s6 + $0x20] sm:$0xff] %vm1187_vm3, %v2047_v53  ;;  %v1936_v59 = vadd.f32 %v2671_v55, %v3626_v60  ;;  %v1930_v62 = vpop.f32.mrb[51].mxu1 }
 0x6b3   :  { %v1931_v63 = vadd.f32 %v3626_v60, %v1930_v62 }
 0x6b4   :  { %v2050_v6 = vsel %vm340_vm1, %v1936_v59, %v2010_v26 }
 0x6b5   :  { %2066 = vst.msk [vmem:[%s3730_s6 + $0x38] sm:$0xff] %vm1187_vm3, %v2050_v6  ;;  %v2049_v7 = vsel %vm340_vm1, %v1931_v63, %v2008_v44  ;;  %v2674_v8 = vpop.f32.mrb[52].mxu1 }
 0x6b6   :  { %2065 = vst.msk [vmem:[%s3730_s6 + $0x30] sm:$0xff] %vm1187_vm3, %v2049_v7  ;;  %v1946_v11 = vadd.f32 %v2674_v8, %v3626_v60  ;;  %v1940_v2 = vpop.f32.mrb[53].mxu1 }
 0x6b7   :  { %v1941_v0 = vadd.f32 %v3626_v60, %v1940_v2 }
 0x6b8   :  { %v2052_v3 = vsel %vm340_vm1, %v1946_v11, %v2014_v52 }
 0x6b9   :  { %2068 = vst.msk [vmem:[%s3730_s6 + $0x48] sm:$0xff] %vm1187_vm3, %v2052_v3  ;;  %v2051_v18 = vsel %vm340_vm1, %v1941_v0, %v2012_v57  ;;  %v2677_v1 = vpop.f32.mrb[54].mxu1 }
 0x6ba   :  { %2067 = vst.msk [vmem:[%s3730_s6 + $0x40] sm:$0xff] %vm1187_vm3, %v2051_v18  ;;  %v1956_v28 = vadd.f32 %v2677_v1, %v3626_v60  ;;  %v1950_v5 = vpop.f32.mrb[55].mxu1 }
 0x6bb   :  { %v1951_v29 = vadd.f32 %v3626_v60, %v1950_v5 }
 0x6bc   :  { %v2054_v4 = vsel %vm340_vm1, %v1956_v28, %v2018_v13 }
 0x6bd   :  { %2070 = vst.msk [vmem:[%s3730_s6 + $0x58] sm:$0xff] %vm1187_vm3, %v2054_v4  ;;  %v2053_v58 = vsel %vm340_vm1, %v1951_v29, %v2016_v16  ;;  %v2680_v31 = vpop.f32.mrb[56].mxu1 }
 0x6be   :  { %2069 = vst.msk [vmem:[%s3730_s6 + $0x50] sm:$0xff] %vm1187_vm3, %v2053_v58  ;;  %v1966_v12 = vadd.f32 %v2680_v31, %v3626_v60  ;;  %v1960_v9 = vpop.f32.mrb[57].mxu1 }
 0x6bf   :  { %v1961_v32 = vadd.f32 %v3626_v60, %v1960_v9 }
 0x6c0   :  { %v2056_v14 = vsel %vm340_vm1, %v1966_v12, %v2022_v61 }
 0x6c1   :  { %2072 = vst.msk [vmem:[%s3730_s6 + $0x68] sm:$0xff] %vm1187_vm3, %v2056_v14  ;;  %v2055_v30 = vsel %vm340_vm1, %v1961_v32, %v2020_v15  ;;  %v2683_v21 = vpop.f32.mrb[58].mxu1 }
 0x6c2   :  { %2071 = vst.msk [vmem:[%s3730_s6 + $0x60] sm:$0xff] %vm1187_vm3, %v2055_v30  ;;  %v1976_v34 = vadd.f32 %v2683_v21, %v3626_v60  ;;  %v1970_v20 = vpop.f32.mrb[59].mxu1 }
 0x6c3   :  { %v1971_v35 = vadd.f32 %v3626_v60, %v1970_v20 }
 0x6c4   :  { %v2058_v19 = vsel %vm340_vm1, %v1976_v34, %v2026_v38 }
 0x6c5   :  { %2074 = vst.msk [vmem:[%s3730_s6 + $0x78] sm:$0xff] %vm1187_vm3, %v2058_v19  ;;  %v2057_v49 = vsel %vm340_vm1, %v1971_v35, %v2024_v36 }
 0x6c6   :  { %2073 = vst.msk [vmem:[%s3730_s6 + $0x70] sm:$0xff] %vm1187_vm3, %v2057_v49 }

</bundles_post_ra>
